<compile_context>
chip_gen: v6e
topology: v6e:2x2x1
jax: 0.10.0
libtpu: 0.0.40
codegen_flags: <defaults>
</compile_context>

<pallas_src>
import functools

import jax
import jax.numpy as jnp
from jax import lax
from jax.experimental import pallas as pl
from jax.experimental.pallas import tpu as pltpu


_SLOPE = 0.2            # LeakyReLU negative slope
_TM_TARGET = 512        # M-tile target (measured ~85% of HBM roofline at 512)


def _round_up(x, m):
    return (x + m - 1) // m * m


@functools.lru_cache(maxsize=None)
def _vmem_budget_bytes():
    """~75% of the device's VMEM; conservative 64 MiB fallback (v7x-safe)."""
    cap = 64 * 1024 * 1024
    try:
        info = pltpu.get_tpu_info()
        cap = int(getattr(info, "vmem_capacity_bytes", cap)) or cap
    except Exception:
        pass
    return (cap * 3) // 4


def _pick_m_tile(M, K, tn, out_bytes, budget):
    """Largest M tile (multiple of 16 for bf16 packing) whose live VMEM fits."""
    if M <= _TM_TARGET:
        return M                          # single full-extent tile (always legal)

    def est(t):
        return (2 * t * K * 2             # bf16 patches tile, double-buffered
                + 2 * K * tn * 2          # resident bf16 weight panel (2 bufs)
                + 2 * t * tn * out_bytes  # output tile
                + 2 * 9 * tn * 4)         # stats + bias blocks

    tm = _TM_TARGET
    while tm > 16 and est(tm) > budget:
        tm = max(16, _round_up(tm // 2, 16))
    return tm


# ---------------------------------------------------------------------------
# Pallas kernel: whole-K conv matmul tile with fused bias / LeakyReLU / stats
# ---------------------------------------------------------------------------
def _make_conv_kernel(apply_act, emit_stats, c_valid, m_valid, tm, need_mask):
    """y = x @ w + b on one (tm, tn) tile.

    grid = (Cout tiles j, M tiles i); the whole contraction dim K is in the
    block, so there is no reduction axis and no accumulator scratch.  When
    `emit_stats`, per-tile partial sum / sum-of-squares of the pre-activation
    output are written to an (8, tn) block indexed by (i, j) -> hierarchical
    f32 reduction in the wrapper, M axis stays fully parallel.
    """

    def kernel(x_ref, w_ref, b_ref, *out_refs):
        if emit_stats:
            o_ref, stat_ref = out_refs
        else:
            (o_ref,) = out_refs

        # (tm, K) bf16 @ (K, tn) bf16 -> (tm, tn) f32 on the MXU.
        y = jnp.dot(x_ref[...], w_ref[...], preferred_element_type=jnp.float32)
        y = y + b_ref[...]
        if c_valid is not None:            # drop the lane padding of the weights
            y = y[:, :c_valid]

        if emit_stats:
            ys = y
            if need_mask:                  # zero rows of the partial last M tile
                rows = (pl.program_id(1) * tm
                        + lax.broadcasted_iota(jnp.int32, y.shape, 0))
                ys = jnp.where(rows < m_valid, y, 0.0)
            stat_ref[...] = jnp.zeros_like(stat_ref)
            stat_ref[0:1, :] = jnp.sum(ys, axis=0, keepdims=True)
            stat_ref[1:2, :] = jnp.sum(ys * ys, axis=0, keepdims=True)

        if apply_act:
            y = jnp.where(y >= 0.0, y, _SLOPE * y)
        o_ref[...] = y.astype(o_ref.dtype)

    return kernel


def _conv_matmul(patches, w2d, bias, apply_act, emit_stats, out_dtype):
    """patches (M, K) bf16 @ w2d (K, C) + bias, K a multiple of 128."""
    M, K = patches.shape
    C = w2d.shape[1]
    patches = patches.astype(jnp.bfloat16)   # no-op when producer wrote bf16

    # Lane-pad only the tiny weight/bias arrays so the MXU sees >=128 output
    # lanes; the kernel slices the pad lanes off, so activations in HBM keep
    # their exact (M, C) shape (no post-hoc [:, :C] copy pass).
    Cp = _round_up(C, 128)
    if C == Cp:
        tn = 256 if C % 256 == 0 else 128
        c_valid = None
        tn_out = tn
    else:
        tn = Cp
        c_valid = C
        tn_out = C
    grid_n = Cp // tn

    budget = _vmem_budget_bytes()
    out_bytes = jnp.dtype(out_dtype).itemsize
    tm = _pick_m_tile(M, K, tn, out_bytes, budget)
    grid_m = pl.cdiv(M, tm)
    need_mask = grid_m * tm != M

    wp = jnp.pad(w2d.astype(jnp.bfloat16), ((0, 0), (0, Cp - C)))
    bp = jnp.pad(bias.astype(jnp.float32)[None, :], ((0, 0), (0, Cp - C)))

    out_shape = [jax.ShapeDtypeStruct((M, C), out_dtype)]
    out_specs = [pl.BlockSpec((tm, tn_out), lambda j, i: (i, j))]
    if emit_stats:
        out_shape.append(jax.ShapeDtypeStruct((grid_m * 8, C), jnp.float32))
        out_specs.append(pl.BlockSpec((8, tn_out), lambda j, i: (i, j)))

    kernel = _make_conv_kernel(apply_act, emit_stats, c_valid, M, tm, need_mask)
    outs = pl.pallas_call(
        kernel,
        out_shape=tuple(out_shape),
        grid=(grid_n, grid_m),              # Cout tiles outermost: the weight
        in_specs=[                          # panel stays resident over the M sweep
            pl.BlockSpec((tm, K), lambda j, i: (i, 0)),
            pl.BlockSpec((K, tn), lambda j, i: (0, j)),
            pl.BlockSpec((1, tn), lambda j, i: (0, j)),
        ],
        out_specs=tuple(out_specs),
        compiler_params=pltpu.CompilerParams(
            dimension_semantics=("parallel", "parallel"),
            vmem_limit_bytes=budget),
    )(patches, wp, bp)

    if emit_stats:
        y, st = outs
        st = st.reshape(grid_m, 8, C)
        return y, (jnp.sum(st[:, 0, :], axis=0), jnp.sum(st[:, 1, :], axis=0))
    (y,) = outs
    return y, None


# ---------------------------------------------------------------------------
# im2col patch extraction (gather-free; stays in bf16)
# ---------------------------------------------------------------------------
def _extract_patches(x_nhwc, k, stride, pad, cin_pad=0):
    """Pad + strided slices + concat.  Feature order (kh, kw, Cin_padded),
    matching the padded-weight reshape.  The channel pad keeps K a multiple of
    128 (only the first conv needs it) and is folded into the same jnp.pad."""
    # TODO(synk): assemble patch tiles in-kernel (manual DMA of the 4 shifted
    # row windows of the raw NHWC activation) to remove the kh*kw-fold
    # duplication this concat writes to HBM.
    N, H, W, C = x_nhwc.shape
    xpad = jnp.pad(x_nhwc, ((0, 0), (pad, pad), (pad, pad), (0, cin_pad)))
    Ho = (H + 2 * pad - k) // stride + 1
    Wo = (W + 2 * pad - k) // stride + 1
    pieces = []
    for di in range(k):
        for dj in range(k):
            pieces.append(
                xpad[:, di:di + (Ho - 1) * stride + 1:stride,
                     dj:dj + (Wo - 1) * stride + 1:stride, :])
    patches = jnp.concatenate(pieces, axis=-1)          # (N, Ho, Wo, k*k*Cpad)
    return patches.reshape(N * Ho * Wo, k * k * (C + cin_pad)), (N, Ho, Wo)


# ---------------------------------------------------------------------------
# Parameters & forward (BatchNorm2d => middle convs have use_bias=False)
# ---------------------------------------------------------------------------
def init_params(key, input_nc, ndf=64, n_layers=3):
    keys = iter(jax.random.split(key, 4 * (n_layers + 2)))

    def conv_w(kk, cin, cout):
        return 0.02 * jax.random.normal(kk, (4, 4, cin, cout), jnp.float32)

    params = []
    # first conv: bias=True, LeakyReLU, no norm
    params.append(dict(w=conv_w(next(keys), input_nc, ndf),
                       b=0.01 * jax.random.normal(next(keys), (ndf,), jnp.float32),
                       stride=2, bn=None))
    nf_mult = 1
    for n in range(1, n_layers):
        nf_prev, nf_mult = nf_mult, min(2 ** n, 8)
        cin, cout = ndf * nf_prev, ndf * nf_mult
        params.append(dict(
            w=conv_w(next(keys), cin, cout),
            b=jnp.zeros((cout,), jnp.float32),                  # use_bias=False
            stride=2,
            bn=dict(gamma=1.0 + 0.02 * jax.random.normal(next(keys), (cout,), jnp.float32),
                    beta=jnp.zeros((cout,), jnp.float32))))
    nf_prev, nf_mult = nf_mult, min(2 ** n_layers, 8)
    cin, cout = ndf * nf_prev, ndf * nf_mult
    params.append(dict(
        w=conv_w(next(keys), cin, cout),
        b=jnp.zeros((cout,), jnp.float32),                      # use_bias=False
        stride=1,
        bn=dict(gamma=1.0 + 0.02 * jax.random.normal(next(keys), (cout,), jnp.float32),
                beta=jnp.zeros((cout,), jnp.float32))))
    # final 1-channel conv: bias=True, no norm, no activation
    params.append(dict(w=conv_w(next(keys), ndf * nf_mult, 1),
                       b=0.01 * jax.random.normal(next(keys), (1,), jnp.float32),
                       stride=1, bn=None))
    return params


def nlayer_discriminator_forward(x_nchw, params):
    # NCHW in / NCHW out (PyTorch convention); NHWC + bf16 internally.
    x = jnp.transpose(x_nchw, (0, 2, 3, 1)).astype(jnp.bfloat16)
    n_conv = len(params)
    for li, p in enumerate(params):
        last = li == n_conv - 1
        has_bn = p["bn"] is not None
        kh, _, cin, cout = p["w"].shape
        cin_pad = _round_up(cin, 8) - cin            # keeps K a multiple of 128
        patches, (N, Ho, Wo) = _extract_patches(x, kh, p["stride"], 1, cin_pad)
        M = N * Ho * Wo
        w2d = jnp.pad(p["w"], ((0, 0), (0, 0), (0, cin_pad), (0, 0))).reshape(-1, cout)

        # LeakyReLU is fused into the conv epilogue only when no norm follows
        # (first conv); BN layers defer it to the affine below; the last conv
        # has no activation.
        act_in_conv = (not has_bn) and (not last)
        out_dtype = jnp.float32 if last else jnp.bfloat16
        y, stats = _conv_matmul(patches, w2d, p["b"], act_in_conv, has_bn, out_dtype)

        if has_bn:
            # Training-mode BatchNorm: biased batch stats over (N, H, W) from
            # the per-M-tile partial sums fused into the conv kernel, reduced
            # hierarchically in f32.
            s1, s2 = stats
            mean = s1 / M
            var = jnp.maximum(s2 / M - mean * mean, 0.0)
            scale = p["bn"]["gamma"] * lax.rsqrt(var + 1e-5)
            shift = p["bn"]["beta"] - mean * scale
            # Per-channel affine + LeakyReLU, left to XLA so it fuses into the
            # next layer's patch construction instead of a standalone HBM pass.
            z = y.astype(jnp.float32) * scale + shift
            y = jnp.where(z >= 0.0, z, _SLOPE * z).astype(jnp.bfloat16)

        x = y.reshape(N, Ho, Wo, cout)
    return jnp.transpose(x.astype(jnp.float32), (0, 3, 1, 2))


# ---------------------------------------------------------------------------
if __name__ == "__main__":
    key = jax.random.PRNGKey(0)
    k_x, k_p = jax.random.split(key)

    # Small shapes: batch=2, input_nc=3, 32x32 image, ndf=8, n_layers=3.
    x = jax.random.normal(k_x, (2, 3, 32, 32), jnp.float32)
    params = init_params(k_p, input_nc=3, ndf=8, n_layers=3)

    fwd = jax.jit(functools.partial(nlayer_discriminator_forward, params=params))
    out = jax.block_until_ready(fwd(x))

    # 32 -> 16 -> 8 -> 4 -> 3 -> 2 spatial; 1 output channel (PatchGAN map).
    assert out.shape == (2, 1, 2, 2), out.shape
    assert bool(jnp.all(jnp.isfinite(out)))
    print("KERNEL_OK")
</pallas_src>

<mosaic_0001>
module attributes {stable_mosaic.version = 11 : i64} {
  func.func @kernel(%arg0: i32, %arg1: i32, %arg2: memref<512x128xbf16, #tpu.memory_space<vmem>>, %arg3: memref<128x128xbf16, #tpu.memory_space<vmem>>, %arg4: memref<1x128xf32, #tpu.memory_space<vmem>>, %arg5: memref<512x8xbf16, #tpu.memory_space<vmem>>) attributes {dimension_semantics = [#tpu.dimension_semantics<parallel>, #tpu.dimension_semantics<parallel>], iteration_bounds = array<i64: 1, 1>, scalar_prefetch = 0 : i64, scratch_operands = 0 : i64, tpu.core_type = #tpu.core_type<tc>, window_params = [{transform_indices = @transform_0, window_bounds = array<i64: 512, 128>}, {transform_indices = @transform_1, window_bounds = array<i64: 128, 128>}, {transform_indices = @transform_2, window_bounds = array<i64: 1, 128>}, {transform_indices = @transform_3, window_bounds = array<i64: 512, 8>}]} {
    %c0 = arith.constant 0 : index
    %c0_0 = arith.constant 0 : index
    %0 = vector.load %arg2[%c0, %c0_0] : memref<512x128xbf16, #tpu.memory_space<vmem>>, vector<512x128xbf16>
    %c0_1 = arith.constant 0 : index
    %c0_2 = arith.constant 0 : index
    %1 = vector.load %arg3[%c0_1, %c0_2] : memref<128x128xbf16, #tpu.memory_space<vmem>>, vector<128x128xbf16>
    %cst = arith.constant dense<0.000000e+00> : vector<512x128xf32>
    %2 = tpu.matmul %0, %1, %cst {dimension_numbers = #tpu.dot_dimension_numbers<[1], [0], [0], [1], [0, 0, 1, 1], [], []>} : vector<512x128xbf16>, vector<128x128xbf16>, vector<512x128xf32> -> vector<512x128xf32>
    %c0_3 = arith.constant 0 : index
    %c0_4 = arith.constant 0 : index
    %3 = vector.load %arg4[%c0_3, %c0_4] : memref<1x128xf32, #tpu.memory_space<vmem>>, vector<1x128xf32>
    %4 = vector.broadcast %3 : vector<1x128xf32> to vector<512x128xf32>
    %5 = arith.addf %2, %4 : vector<512x128xf32>
    %6 = vector.extract_strided_slice %5 {offsets = [0, 0], sizes = [512, 8], strides = [1, 1]} : vector<512x128xf32> to vector<512x8xf32>
    %cst_5 = arith.constant 0.000000e+00 : f32
    %7 = vector.broadcast %cst_5 : f32 to vector<512x8xf32>
    %8 = arith.cmpf oge, %6, %7 : vector<512x8xf32>
    %cst_6 = arith.constant 2.000000e-01 : f32
    %9 = vector.broadcast %cst_6 : f32 to vector<512x8xf32>
    %10 = arith.mulf %9, %6 : vector<512x8xf32>
    %11 = arith.select %8, %6, %10 : vector<512x8xi1>, vector<512x8xf32>
    %12 = arith.truncf %11 : vector<512x8xf32> to vector<512x8xbf16>
    %c0_7 = arith.constant 0 : index
    %c0_8 = arith.constant 0 : index
    %13 = vector.load %arg5[%c0_7, %c0_8] : memref<512x8xbf16, #tpu.memory_space<vmem>>, vector<512x8xbf16>
    tpu.vector_store %arg5[%c0_7, %c0_8], %12 {strides = array<i32>} : memref<512x8xbf16, #tpu.memory_space<vmem>>, vector<512x8xbf16>,
    return
  }
  func.func @transform_0(%arg0: i32, %arg1: i32) -> (i32, i32) {
    %c0_i32 = arith.constant 0 : i32
    %c0_i32_0 = arith.constant 0 : i32
    return %arg1, %c0_i32 : i32, i32
  }
  func.func @transform_1(%arg0: i32, %arg1: i32) -> (i32, i32) {
    %c0_i32 = arith.constant 0 : i32
    %c0_i32_0 = arith.constant 0 : i32
    return %c0_i32, %arg0 : i32, i32
  }
  func.func @transform_2(%arg0: i32, %arg1: i32) -> (i32, i32) {
    %c0_i32 = arith.constant 0 : i32
    %c0_i32_0 = arith.constant 0 : i32
    return %c0_i32, %arg0 : i32, i32
  }
  func.func @transform_3(%arg0: i32, %arg1: i32) -> (i32, i32) {
    %c0_i32 = arith.constant 0 : i32
    return %arg1, %arg0 : i32, i32
  }
}

module attributes {stable_mosaic.version = 11 : i64} {
  func.func @kernel(%arg0: i32, %arg1: i32, %arg2: memref<128x128xbf16, #tpu.memory_space<vmem>>, %arg3: memref<128x128xbf16, #tpu.memory_space<vmem>>, %arg4: memref<1x128xf32, #tpu.memory_space<vmem>>, %arg5: memref<128x16xbf16, #tpu.memory_space<vmem>>, %arg6: memref<8x16xf32, #tpu.memory_space<vmem>>) attributes {dimension_semantics = [#tpu.dimension_semantics<parallel>, #tpu.dimension_semantics<parallel>], iteration_bounds = array<i64: 1, 1>, scalar_prefetch = 0 : i64, scratch_operands = 0 : i64, tpu.core_type = #tpu.core_type<tc>, window_params = [{transform_indices = @transform_0, window_bounds = array<i64: 128, 128>}, {transform_indices = @transform_1, window_bounds = array<i64: 128, 128>}, {transform_indices = @transform_2, window_bounds = array<i64: 1, 128>}, {transform_indices = @transform_3, window_bounds = array<i64: 128, 16>}, {transform_indices = @transform_4, window_bounds = array<i64: 8, 16>}]} {
    %c0 = arith.constant 0 : index
    %c0_0 = arith.constant 0 : index
    %0 = vector.load %arg2[%c0, %c0_0] : memref<128x128xbf16, #tpu.memory_space<vmem>>, vector<128x128xbf16>
    %c0_1 = arith.constant 0 : index
    %c0_2 = arith.constant 0 : index
    %1 = vector.load %arg3[%c0_1, %c0_2] : memref<128x128xbf16, #tpu.memory_space<vmem>>, vector<128x128xbf16>
    %cst = arith.constant dense<0.000000e+00> : vector<128x128xf32>
    %2 = tpu.matmul %0, %1, %cst {dimension_numbers = #tpu.dot_dimension_numbers<[1], [0], [0], [1], [0, 0, 1, 1], [], []>} : vector<128x128xbf16>, vector<128x128xbf16>, vector<128x128xf32> -> vector<128x128xf32>
    %c0_3 = arith.constant 0 : index
    %c0_4 = arith.constant 0 : index
    %3 = vector.load %arg4[%c0_3, %c0_4] : memref<1x128xf32, #tpu.memory_space<vmem>>, vector<1x128xf32>
    %4 = vector.broadcast %3 : vector<1x128xf32> to vector<128x128xf32>
    %5 = arith.addf %2, %4 : vector<128x128xf32>
    %6 = vector.extract_strided_slice %5 {offsets = [0, 0], sizes = [128, 16], strides = [1, 1]} : vector<128x128xf32> to vector<128x16xf32>
    %cst_5 = arith.constant 0.000000e+00 : f32
    %7 = vector.broadcast %cst_5 : f32 to vector<8x16xf32>
    %c0_6 = arith.constant 0 : index
    %c0_7 = arith.constant 0 : index
    %8 = vector.load %arg6[%c0_6, %c0_7] : memref<8x16xf32, #tpu.memory_space<vmem>>, vector<8x16xf32>
    tpu.vector_store %arg6[%c0_6, %c0_7], %7 {strides = array<i32>} : memref<8x16xf32, #tpu.memory_space<vmem>>, vector<8x16xf32>,
    %cst_8 = arith.constant dense<0.000000e+00> : vector<16xf32>
    %9 = vector.multi_reduction <add>, %6, %cst_8 [0] : vector<128x16xf32> to vector<16xf32>
    %10 = vector.shape_cast %9 : vector<16xf32> to vector<1x16xf32>
    %c0_9 = arith.constant 0 : index
    %c0_10 = arith.constant 0 : index
    %11 = vector.load %arg6[%c0_9, %c0_10] : memref<8x16xf32, #tpu.memory_space<vmem>>, vector<1x16xf32>
    tpu.vector_store %arg6[%c0_9, %c0_10], %10 {strides = array<i32>} : memref<8x16xf32, #tpu.memory_space<vmem>>, vector<1x16xf32>,
    %12 = arith.mulf %6, %6 : vector<128x16xf32>
    %cst_11 = arith.constant dense<0.000000e+00> : vector<16xf32>
    %13 = vector.multi_reduction <add>, %12, %cst_11 [0] : vector<128x16xf32> to vector<16xf32>
    %14 = vector.shape_cast %13 : vector<16xf32> to vector<1x16xf32>
    %c1 = arith.constant 1 : index
    %c0_12 = arith.constant 0 : index
    %15 = vector.load %arg6[%c1, %c0_12] : memref<8x16xf32, #tpu.memory_space<vmem>>, vector<1x16xf32>
    tpu.vector_store %arg6[%c1, %c0_12], %14 {strides = array<i32>} : memref<8x16xf32, #tpu.memory_space<vmem>>, vector<1x16xf32>,
    %16 = arith.truncf %6 : vector<128x16xf32> to vector<128x16xbf16>
    %c0_13 = arith.constant 0 : index
    %c0_14 = arith.constant 0 : index
    %17 = vector.load %arg5[%c0_13, %c0_14] : memref<128x16xbf16, #tpu.memory_space<vmem>>, vector<128x16xbf16>
    tpu.vector_store %arg5[%c0_13, %c0_14], %16 {strides = array<i32>} : memref<128x16xbf16, #tpu.memory_space<vmem>>, vector<128x16xbf16>,
    return
  }
  func.func @transform_0(%arg0: i32, %arg1: i32) -> (i32, i32) {
    %c0_i32 = arith.constant 0 : i32
    %c0_i32_0 = arith.constant 0 : i32
    return %arg1, %c0_i32 : i32, i32
  }
  func.func @transform_1(%arg0: i32, %arg1: i32) -> (i32, i32) {
    %c0_i32 = arith.constant 0 : i32
    %c0_i32_0 = arith.constant 0 : i32
    return %c0_i32, %arg0 : i32, i32
  }
  func.func @transform_2(%arg0: i32, %arg1: i32) -> (i32, i32) {
    %c0_i32 = arith.constant 0 : i32
    %c0_i32_0 = arith.constant 0 : i32
    return %c0_i32, %arg0 : i32, i32
  }
  func.func @transform_3(%arg0: i32, %arg1: i32) -> (i32, i32) {
    %c0_i32 = arith.constant 0 : i32
    return %arg1, %arg0 : i32, i32
  }
  func.func @transform_4(%arg0: i32, %arg1: i32) -> (i32, i32) {
    %c0_i32 = arith.constant 0 : i32
    return %arg1, %arg0 : i32, i32
  }
}

module attributes {stable_mosaic.version = 11 : i64} {
  func.func @kernel(%arg0: i32, %arg1: i32, %arg2: memref<32x256xbf16, #tpu.memory_space<vmem>>, %arg3: memref<256x128xbf16, #tpu.memory_space<vmem>>, %arg4: memref<1x128xf32, #tpu.memory_space<vmem>>, %arg5: memref<32x32xbf16, #tpu.memory_space<vmem>>, %arg6: memref<8x32xf32, #tpu.memory_space<vmem>>) attributes {dimension_semantics = [#tpu.dimension_semantics<parallel>, #tpu.dimension_semantics<parallel>], iteration_bounds = array<i64: 1, 1>, scalar_prefetch = 0 : i64, scratch_operands = 0 : i64, tpu.core_type = #tpu.core_type<tc>, window_params = [{transform_indices = @transform_0, window_bounds = array<i64: 32, 256>}, {transform_indices = @transform_1, window_bounds = array<i64: 256, 128>}, {transform_indices = @transform_2, window_bounds = array<i64: 1, 128>}, {transform_indices = @transform_3, window_bounds = array<i64: 32, 32>}, {transform_indices = @transform_4, window_bounds = array<i64: 8, 32>}]} {
    %c0 = arith.constant 0 : index
    %c0_0 = arith.constant 0 : index
    %0 = vector.load %arg2[%c0, %c0_0] : memref<32x256xbf16, #tpu.memory_space<vmem>>, vector<32x256xbf16>
    %c0_1 = arith.constant 0 : index
    %c0_2 = arith.constant 0 : index
    %1 = vector.load %arg3[%c0_1, %c0_2] : memref<256x128xbf16, #tpu.memory_space<vmem>>, vector<256x128xbf16>
    %cst = arith.constant dense<0.000000e+00> : vector<32x128xf32>
    %2 = tpu.matmul %0, %1, %cst {dimension_numbers = #tpu.dot_dimension_numbers<[1], [0], [0], [1], [0, 0, 1, 1], [], []>} : vector<32x256xbf16>, vector<256x128xbf16>, vector<32x128xf32> -> vector<32x128xf32>
    %c0_3 = arith.constant 0 : index
    %c0_4 = arith.constant 0 : index
    %3 = vector.load %arg4[%c0_3, %c0_4] : memref<1x128xf32, #tpu.memory_space<vmem>>, vector<1x128xf32>
    %4 = vector.broadcast %3 : vector<1x128xf32> to vector<32x128xf32>
    %5 = arith.addf %2, %4 : vector<32x128xf32>
    %6 = vector.extract_strided_slice %5 {offsets = [0, 0], sizes = [32, 32], strides = [1, 1]} : vector<32x128xf32> to vector<32x32xf32>
    %cst_5 = arith.constant 0.000000e+00 : f32
    %7 = vector.broadcast %cst_5 : f32 to vector<8x32xf32>
    %c0_6 = arith.constant 0 : index
    %c0_7 = arith.constant 0 : index
    %8 = vector.load %arg6[%c0_6, %c0_7] : memref<8x32xf32, #tpu.memory_space<vmem>>, vector<8x32xf32>
    tpu.vector_store %arg6[%c0_6, %c0_7], %7 {strides = array<i32>} : memref<8x32xf32, #tpu.memory_space<vmem>>, vector<8x32xf32>,
    %cst_8 = arith.constant dense<0.000000e+00> : vector<32xf32>
    %9 = vector.multi_reduction <add>, %6, %cst_8 [0] : vector<32x32xf32> to vector<32xf32>
    %10 = vector.shape_cast %9 : vector<32xf32> to vector<1x32xf32>
    %c0_9 = arith.constant 0 : index
    %c0_10 = arith.constant 0 : index
    %11 = vector.load %arg6[%c0_9, %c0_10] : memref<8x32xf32, #tpu.memory_space<vmem>>, vector<1x32xf32>
    tpu.vector_store %arg6[%c0_9, %c0_10], %10 {strides = array<i32>} : memref<8x32xf32, #tpu.memory_space<vmem>>, vector<1x32xf32>,
    %12 = arith.mulf %6, %6 : vector<32x32xf32>
    %cst_11 = arith.constant dense<0.000000e+00> : vector<32xf32>
    %13 = vector.multi_reduction <add>, %12, %cst_11 [0] : vector<32x32xf32> to vector<32xf32>
    %14 = vector.shape_cast %13 : vector<32xf32> to vector<1x32xf32>
    %c1 = arith.constant 1 : index
    %c0_12 = arith.constant 0 : index
    %15 = vector.load %arg6[%c1, %c0_12] : memref<8x32xf32, #tpu.memory_space<vmem>>, vector<1x32xf32>
    tpu.vector_store %arg6[%c1, %c0_12], %14 {strides = array<i32>} : memref<8x32xf32, #tpu.memory_space<vmem>>, vector<1x32xf32>,
    %16 = arith.truncf %6 : vector<32x32xf32> to vector<32x32xbf16>
    %c0_13 = arith.constant 0 : index
    %c0_14 = arith.constant 0 : index
    %17 = vector.load %arg5[%c0_13, %c0_14] : memref<32x32xbf16, #tpu.memory_space<vmem>>, vector<32x32xbf16>
    tpu.vector_store %arg5[%c0_13, %c0_14], %16 {strides = array<i32>} : memref<32x32xbf16, #tpu.memory_space<vmem>>, vector<32x32xbf16>,
    return
  }
  func.func @transform_0(%arg0: i32, %arg1: i32) -> (i32, i32) {
    %c0_i32 = arith.constant 0 : i32
    %c0_i32_0 = arith.constant 0 : i32
    return %arg1, %c0_i32 : i32, i32
  }
  func.func @transform_1(%arg0: i32, %arg1: i32) -> (i32, i32) {
    %c0_i32 = arith.constant 0 : i32
    %c0_i32_0 = arith.constant 0 : i32
    return %c0_i32, %arg0 : i32, i32
  }
  func.func @transform_2(%arg0: i32, %arg1: i32) -> (i32, i32) {
    %c0_i32 = arith.constant 0 : i32
    %c0_i32_0 = arith.constant 0 : i32
    return %c0_i32, %arg0 : i32, i32
  }
  func.func @transform_3(%arg0: i32, %arg1: i32) -> (i32, i32) {
    %c0_i32 = arith.constant 0 : i32
    return %arg1, %arg0 : i32, i32
  }
  func.func @transform_4(%arg0: i32, %arg1: i32) -> (i32, i32) {
    %c0_i32 = arith.constant 0 : i32
    return %arg1, %arg0 : i32, i32
  }
}

module attributes {stable_mosaic.version = 11 : i64} {
  func.func @kernel(%arg0: i32, %arg1: i32, %arg2: memref<18x512xbf16, #tpu.memory_space<vmem>>, %arg3: memref<512x128xbf16, #tpu.memory_space<vmem>>, %arg4: memref<1x128xf32, #tpu.memory_space<vmem>>, %arg5: memref<18x64xbf16, #tpu.memory_space<vmem>>, %arg6: memref<8x64xf32, #tpu.memory_space<vmem>>) attributes {dimension_semantics = [#tpu.dimension_semantics<parallel>, #tpu.dimension_semantics<parallel>], iteration_bounds = array<i64: 1, 1>, scalar_prefetch = 0 : i64, scratch_operands = 0 : i64, tpu.core_type = #tpu.core_type<tc>, window_params = [{transform_indices = @transform_0, window_bounds = array<i64: 18, 512>}, {transform_indices = @transform_1, window_bounds = array<i64: 512, 128>}, {transform_indices = @transform_2, window_bounds = array<i64: 1, 128>}, {transform_indices = @transform_3, window_bounds = array<i64: 18, 64>}, {transform_indices = @transform_4, window_bounds = array<i64: 8, 64>}]} {
    %c0 = arith.constant 0 : index
    %c0_0 = arith.constant 0 : index
    %0 = vector.load %arg2[%c0, %c0_0] : memref<18x512xbf16, #tpu.memory_space<vmem>>, vector<18x512xbf16>
    %c0_1 = arith.constant 0 : index
    %c0_2 = arith.constant 0 : index
    %1 = vector.load %arg3[%c0_1, %c0_2] : memref<512x128xbf16, #tpu.memory_space<vmem>>, vector<512x128xbf16>
    %cst = arith.constant dense<0.000000e+00> : vector<18x128xf32>
    %2 = tpu.matmul %0, %1, %cst {dimension_numbers = #tpu.dot_dimension_numbers<[1], [0], [0], [1], [0, 0, 1, 1], [], []>} : vector<18x512xbf16>, vector<512x128xbf16>, vector<18x128xf32> -> vector<18x128xf32>
    %c0_3 = arith.constant 0 : index
    %c0_4 = arith.constant 0 : index
    %3 = vector.load %arg4[%c0_3, %c0_4] : memref<1x128xf32, #tpu.memory_space<vmem>>, vector<1x128xf32>
    %4 = vector.broadcast %3 : vector<1x128xf32> to vector<18x128xf32>
    %5 = arith.addf %2, %4 : vector<18x128xf32>
    %6 = vector.extract_strided_slice %5 {offsets = [0, 0], sizes = [18, 64], strides = [1, 1]} : vector<18x128xf32> to vector<18x64xf32>
    %cst_5 = arith.constant 0.000000e+00 : f32
    %7 = vector.broadcast %cst_5 : f32 to vector<8x64xf32>
    %c0_6 = arith.constant 0 : index
    %c0_7 = arith.constant 0 : index
    %8 = vector.load %arg6[%c0_6, %c0_7] : memref<8x64xf32, #tpu.memory_space<vmem>>, vector<8x64xf32>
    tpu.vector_store %arg6[%c0_6, %c0_7], %7 {strides = array<i32>} : memref<8x64xf32, #tpu.memory_space<vmem>>, vector<8x64xf32>,
    %cst_8 = arith.constant dense<0.000000e+00> : vector<64xf32>
    %9 = vector.multi_reduction <add>, %6, %cst_8 [0] : vector<18x64xf32> to vector<64xf32>
    %10 = vector.shape_cast %9 : vector<64xf32> to vector<1x64xf32>
    %c0_9 = arith.constant 0 : index
    %c0_10 = arith.constant 0 : index
    %11 = vector.load %arg6[%c0_9, %c0_10] : memref<8x64xf32, #tpu.memory_space<vmem>>, vector<1x64xf32>
    tpu.vector_store %arg6[%c0_9, %c0_10], %10 {strides = array<i32>} : memref<8x64xf32, #tpu.memory_space<vmem>>, vector<1x64xf32>,
    %12 = arith.mulf %6, %6 : vector<18x64xf32>
    %cst_11 = arith.constant dense<0.000000e+00> : vector<64xf32>
    %13 = vector.multi_reduction <add>, %12, %cst_11 [0] : vector<18x64xf32> to vector<64xf32>
    %14 = vector.shape_cast %13 : vector<64xf32> to vector<1x64xf32>
    %c1 = arith.constant 1 : index
    %c0_12 = arith.constant 0 : index
    %15 = vector.load %arg6[%c1, %c0_12] : memref<8x64xf32, #tpu.memory_space<vmem>>, vector<1x64xf32>
    tpu.vector_store %arg6[%c1, %c0_12], %14 {strides = array<i32>} : memref<8x64xf32, #tpu.memory_space<vmem>>, vector<1x64xf32>,
    %16 = arith.truncf %6 : vector<18x64xf32> to vector<18x64xbf16>
    %c0_13 = arith.constant 0 : index
    %c0_14 = arith.constant 0 : index
    %17 = vector.load %arg5[%c0_13, %c0_14] : memref<18x64xbf16, #tpu.memory_space<vmem>>, vector<18x64xbf16>
    tpu.vector_store %arg5[%c0_13, %c0_14], %16 {strides = array<i32>} : memref<18x64xbf16, #tpu.memory_space<vmem>>, vector<18x64xbf16>,
    return
  }
  func.func @transform_0(%arg0: i32, %arg1: i32) -> (i32, i32) {
    %c0_i32 = arith.constant 0 : i32
    %c0_i32_0 = arith.constant 0 : i32
    return %arg1, %c0_i32 : i32, i32
  }
  func.func @transform_1(%arg0: i32, %arg1: i32) -> (i32, i32) {
    %c0_i32 = arith.constant 0 : i32
    %c0_i32_0 = arith.constant 0 : i32
    return %c0_i32, %arg0 : i32, i32
  }
  func.func @transform_2(%arg0: i32, %arg1: i32) -> (i32, i32) {
    %c0_i32 = arith.constant 0 : i32
    %c0_i32_0 = arith.constant 0 : i32
    return %c0_i32, %arg0 : i32, i32
  }
  func.func @transform_3(%arg0: i32, %arg1: i32) -> (i32, i32) {
    %c0_i32 = arith.constant 0 : i32
    return %arg1, %arg0 : i32, i32
  }
  func.func @transform_4(%arg0: i32, %arg1: i32) -> (i32, i32) {
    %c0_i32 = arith.constant 0 : i32
    return %arg1, %arg0 : i32, i32
  }
}

module attributes {stable_mosaic.version = 11 : i64} {
  func.func @kernel(%arg0: i32, %arg1: i32, %arg2: memref<8x1024xbf16, #tpu.memory_space<vmem>>, %arg3: memref<1024x128xbf16, #tpu.memory_space<vmem>>, %arg4: memref<1x128xf32, #tpu.memory_space<vmem>>, %arg5: memref<8x1xf32, #tpu.memory_space<vmem>>) attributes {dimension_semantics = [#tpu.dimension_semantics<parallel>, #tpu.dimension_semantics<parallel>], iteration_bounds = array<i64: 1, 1>, scalar_prefetch = 0 : i64, scratch_operands = 0 : i64, tpu.core_type = #tpu.core_type<tc>, window_params = [{transform_indices = @transform_0, window_bounds = array<i64: 8, 1024>}, {transform_indices = @transform_1, window_bounds = array<i64: 1024, 128>}, {transform_indices = @transform_2, window_bounds = array<i64: 1, 128>}, {transform_indices = @transform_3, window_bounds = array<i64: 8, 1>}]} {
    %c0 = arith.constant 0 : index
    %c0_0 = arith.constant 0 : index
    %0 = vector.load %arg2[%c0, %c0_0] : memref<8x1024xbf16, #tpu.memory_space<vmem>>, vector<8x1024xbf16>
    %c0_1 = arith.constant 0 : index
    %c0_2 = arith.constant 0 : index
    %1 = vector.load %arg3[%c0_1, %c0_2] : memref<1024x128xbf16, #tpu.memory_space<vmem>>, vector<1024x128xbf16>
    %cst = arith.constant dense<0.000000e+00> : vector<8x128xf32>
    %2 = tpu.matmul %0, %1, %cst {dimension_numbers = #tpu.dot_dimension_numbers<[1], [0], [0], [1], [0, 0, 1, 1], [], []>} : vector<8x1024xbf16>, vector<1024x128xbf16>, vector<8x128xf32> -> vector<8x128xf32>
    %c0_3 = arith.constant 0 : index
    %c0_4 = arith.constant 0 : index
    %3 = vector.load %arg4[%c0_3, %c0_4] : memref<1x128xf32, #tpu.memory_space<vmem>>, vector<1x128xf32>
    %4 = vector.broadcast %3 : vector<1x128xf32> to vector<8x128xf32>
    %5 = arith.addf %2, %4 : vector<8x128xf32>
    %6 = vector.extract_strided_slice %5 {offsets = [0, 0], sizes = [8, 1], strides = [1, 1]} : vector<8x128xf32> to vector<8x1xf32>
    %c0_5 = arith.constant 0 : index
    %c0_6 = arith.constant 0 : index
    %7 = vector.load %arg5[%c0_5, %c0_6] : memref<8x1xf32, #tpu.memory_space<vmem>>, vector<8x1xf32>
    tpu.vector_store %arg5[%c0_5, %c0_6], %6 {strides = array<i32>} : memref<8x1xf32, #tpu.memory_space<vmem>>, vector<8x1xf32>,
    return
  }
  func.func @transform_0(%arg0: i32, %arg1: i32) -> (i32, i32) {
    %c0_i32 = arith.constant 0 : i32
    %c0_i32_0 = arith.constant 0 : i32
    return %arg1, %c0_i32 : i32, i32
  }
  func.func @transform_1(%arg0: i32, %arg1: i32) -> (i32, i32) {
    %c0_i32 = arith.constant 0 : i32
    %c0_i32_0 = arith.constant 0 : i32
    return %c0_i32, %arg0 : i32, i32
  }
  func.func @transform_2(%arg0: i32, %arg1: i32) -> (i32, i32) {
    %c0_i32 = arith.constant 0 : i32
    %c0_i32_0 = arith.constant 0 : i32
    return %c0_i32, %arg0 : i32, i32
  }
  func.func @transform_3(%arg0: i32, %arg1: i32) -> (i32, i32) {
    %c0_i32 = arith.constant 0 : i32
    return %arg1, %arg0 : i32, i32
  }
}

</mosaic_0001>

<bundles_post_ra>
// kernel: nlayer_discriminator_forward.5
= control target key start
LH: loop header
LB: loop body
LE: loop exit
PB: predicated region body
PF: predicated region fallthrough
CT: control target
= control target key end

     0   :  { %vm1079_vm2 = vcmask 60416   ;;  %s1985_s1 = inlined_call_operand.vmem [shape: bf16[128,128], index: 1, kind: input, shape index: {}]   ;;  %s1986_s0 = inlined_call_operand.vmem [shape: bf16[512,128], index: 0, kind: input, shape index: {}]   ;;  %s1987_s2 = inlined_call_operand.vmem [shape: f32[1,128], index: 2, kind: input, shape index: {}]   ;;  %s1988_s3 = inlined_call_operand.vmem [shape: bf16[512,8], index: 3, kind: output, shape index: {}]  }
   0x1   :  { %v1453_v0 = vld [vmem:[%s1985_s1 + $0x38] sm:$0xff]   ;;  %v1454_v1 = vld [vmem:[%s1985_s1 + $0x30] sm:$0xff]   ;;  %v1455_v2 = vld [vmem:[%s1985_s1 + $0x28] sm:$0xff]  }
   0x2   :  { %1357 = vmatprep.subr.bf16.mxu0 %v1453_v0  ;;  %1437 = vmatprep.subr.bf16.mxu1 %v1453_v0  ;;  %v1456_v3 = vld [vmem:[%s1985_s1 + $0x20] sm:$0xff]   ;;  %v1457_v6 = vld [vmem:[%s1985_s1 + $0x18] sm:$0xff]   ;;  %v1458_v7 = vld [vmem:[%s1985_s1 + $0x10] sm:$0xff]  }
   0x3   :  { %1358 = vmatpush3.bf16.msra.mxu0 %v1453_v0  ;;  %1445 = vmatpush3.bf16.msra.mxu1 %v1453_v0  ;;  %v1461_v4 = vld [vmem:[%s1986_s0] sm:$0xff]   ;;  %v1459_v8 = vld [vmem:[%s1985_s1 + $0x8] sm:$0xff]   ;;  %v1465_v12 = vld [vmem:[%s1986_s0 + $0x10] sm:$0xff]  }
   0x4   :  { %1359 = vmatprep.subr.bf16.mxu0 %v1454_v1  ;;  %1438 = vmatprep.subr.bf16.mxu1 %v1454_v1  ;;  %v1462_v5 = vld [vmem:[%s1986_s0 + $0x80] sm:$0xff]   ;;  %v1463_v10 = vld [vmem:[%s1986_s0 + $0x8] sm:$0xff]   ;;  %v1466_v13 = vld [vmem:[%s1986_s0 + $0x90] sm:$0xff]  }
   0x5   :  { %1373 = vmatprep.mubr.bf16.mxu0 %v1461_v4  ;;  %1405 = vmatprep.mubr.bf16.mxu1 %v1462_v5  ;;  %v1460_v9 = vld [vmem:[%s1985_s1] sm:$0xff]   ;;  %v1464_v11 = vld [vmem:[%s1986_s0 + $0x88] sm:$0xff]   ;;  %v1467_v14 = vld [vmem:[%s1986_s0 + $0x18] sm:$0xff]  }
   0x6   :  { %v1468_v15 = vld [vmem:[%s1986_s0 + $0x98] sm:$0xff]   ;;  %v1469_v16 = vld [vmem:[%s1986_s0 + $0x20] sm:$0xff]   ;;  %v1471_v18 = vld [vmem:[%s1986_s0 + $0x28] sm:$0xff]  }
   0x7   :  { %1360 = vmatpush3.bf16.msra.mxu0 %v1454_v1  ;;  %1446 = vmatpush3.bf16.msra.mxu1 %v1454_v1  ;;  %v1470_v17 = vld [vmem:[%s1986_s0 + $0xa0] sm:$0xff]   ;;  %v1472_v19 = vld [vmem:[%s1986_s0 + $0xa8] sm:$0xff]   ;;  %v1473_v20 = vld [vmem:[%s1986_s0 + $0x30] sm:$0xff]  }
   0x8   :  { %1361 = vmatprep.subr.bf16.mxu0 %v1455_v2  ;;  %1439 = vmatprep.subr.bf16.mxu1 %v1455_v2  ;;  %v1474_v21 = vld [vmem:[%s1986_s0 + $0xb0] sm:$0xff]   ;;  %v1475_v22 = vld [vmem:[%s1986_s0 + $0x38] sm:$0xff]   ;;  %v1477_v24 = vld [vmem:[%s1986_s0 + $0x40] sm:$0xff]  }
   0x9   :  { %v1476_v23 = vld [vmem:[%s1986_s0 + $0xb8] sm:$0xff]   ;;  %v1478_v25 = vld [vmem:[%s1986_s0 + $0xc0] sm:$0xff]   ;;  %v1479_v26 = vld [vmem:[%s1986_s0 + $0x48] sm:$0xff]  }
   0xa   :  { %v1480_v27 = vld [vmem:[%s1986_s0 + $0xc8] sm:$0xff]   ;;  %v1481_v28 = vld [vmem:[%s1986_s0 + $0x50] sm:$0xff]   ;;  %v1483_v30 = vld [vmem:[%s1986_s0 + $0x58] sm:$0xff]  }
   0xb   :  { %1362 = vmatpush3.bf16.msra.mxu0 %v1455_v2  ;;  %1447 = vmatpush3.bf16.msra.mxu1 %v1455_v2  ;;  %v1482_v29 = vld [vmem:[%s1986_s0 + $0xd0] sm:$0xff]   ;;  %v1484_v31 = vld [vmem:[%s1986_s0 + $0xd8] sm:$0xff]   ;;  %v1485_v32 = vld [vmem:[%s1986_s0 + $0x60] sm:$0xff]  }
   0xc   :  { %1363 = vmatprep.subr.bf16.mxu0 %v1456_v3  ;;  %1440 = vmatprep.subr.bf16.mxu1 %v1456_v3  ;;  %v1486_v33 = vld [vmem:[%s1986_s0 + $0xe0] sm:$0xff]   ;;  %v1487_v34 = vld [vmem:[%s1986_s0 + $0x68] sm:$0xff]   ;;  %v1489_v36 = vld [vmem:[%s1986_s0 + $0x70] sm:$0xff]  }
   0xd   :  { %v1488_v35 = vld [vmem:[%s1986_s0 + $0xe8] sm:$0xff]   ;;  %v1490_v37 = vld [vmem:[%s1986_s0 + $0xf0] sm:$0xff]   ;;  %v1491_v38 = vld [vmem:[%s1986_s0 + $0x78] sm:$0xff]  }
   0xe   :  { %v1492_v39 = vld [vmem:[%s1986_s0 + $0xf8] sm:$0xff]   ;;  %v1636_v40 = vld [vmem:[%s1987_s2] ss:$0 sm:$0xff] }
   0xf   :  { %1364 = vmatpush3.bf16.msra.mxu0 %v1456_v3  ;;  %1448 = vmatpush3.bf16.msra.mxu1 %v1456_v3 }
  0x10   :  { %1365 = vmatprep.subr.bf16.mxu0 %v1457_v6  ;;  %1441 = vmatprep.subr.bf16.mxu1 %v1457_v6 }
  0x13   :  { %1366 = vmatpush3.bf16.msra.mxu0 %v1457_v6  ;;  %1449 = vmatpush3.bf16.msra.mxu1 %v1457_v6 }
  0x14   :  { %1367 = vmatprep.subr.bf16.mxu0 %v1458_v7  ;;  %1442 = vmatprep.subr.bf16.mxu1 %v1458_v7 }
  0x17   :  { %1368 = vmatpush3.bf16.msra.mxu0 %v1458_v7  ;;  %1450 = vmatpush3.bf16.msra.mxu1 %v1458_v7 }
  0x18   :  { %1369 = vmatprep.subr.bf16.mxu0 %v1459_v8  ;;  %1443 = vmatprep.subr.bf16.mxu1 %v1459_v8 }
  0x1b   :  { %1370 = vmatpush3.bf16.msra.mxu0 %v1459_v8  ;;  %1451 = vmatpush3.bf16.msra.mxu1 %v1459_v8 }
  0x1c   :  { %1371 = vmatprep.subr.bf16.mxu0 %v1460_v9  ;;  %1444 = vmatprep.subr.bf16.mxu1 %v1460_v9 }
  0x1f   :  { %1372 = vmatpush3.bf16.msra.mxu0 %v1460_v9  ;;  %1452 = vmatpush3.bf16.msra.mxu1 %v1460_v9 }
  0x22   :  { %1374 = vmatmul.mubr.bf16.vlgmr.msra.gmra.mxu0 %v1463_v10  ;;  %1406 = vmatmul.mubr.bf16.vlgmr.msra.gmra.mxu1 %v1464_v11 }
  0x23   :  { %1377 = vmatprep.mubr.bf16.mxu0 %v1465_v12  ;;  %1409 = vmatprep.mubr.bf16.mxu1 %v1466_v13 }
  0x2a   :  { %1378 = vmatmul.mubr.bf16.gmra.mxu0 %v1467_v14  ;;  %1410 = vmatmul.mubr.bf16.gmra.mxu1 %v1468_v15 }
  0x2b   :  { %1381 = vmatprep.mubr.bf16.mxu0 %v1469_v16  ;;  %1413 = vmatprep.mubr.bf16.mxu1 %v1470_v17 }
  0x32   :  { %1382 = vmatmul.mubr.bf16.gmra.mxu0 %v1471_v18  ;;  %1414 = vmatmul.mubr.bf16.gmra.mxu1 %v1472_v19 }
  0x33   :  { %1385 = vmatprep.mubr.bf16.mxu0 %v1473_v20  ;;  %1417 = vmatprep.mubr.bf16.mxu1 %v1474_v21 }
  0x3a   :  { %1386 = vmatmul.mubr.bf16.gmra.mxu0 %v1475_v22  ;;  %1418 = vmatmul.mubr.bf16.gmra.mxu1 %v1476_v23 }
  0x3b   :  { %1389 = vmatprep.mubr.bf16.mxu0 %v1477_v24  ;;  %1421 = vmatprep.mubr.bf16.mxu1 %v1478_v25 }
  0x42   :  { %1390 = vmatmul.mubr.bf16.gmra.mxu0 %v1479_v26  ;;  %1422 = vmatmul.mubr.bf16.gmra.mxu1 %v1480_v27 }
  0x43   :  { %1393 = vmatprep.mubr.bf16.mxu0 %v1481_v28  ;;  %1425 = vmatprep.mubr.bf16.mxu1 %v1482_v29 }
  0x4a   :  { %1394 = vmatmul.mubr.bf16.gmra.mxu0 %v1483_v30  ;;  %1426 = vmatmul.mubr.bf16.gmra.mxu1 %v1484_v31 }
  0x4b   :  { %1397 = vmatprep.mubr.bf16.mxu0 %v1485_v32  ;;  %1429 = vmatprep.mubr.bf16.mxu1 %v1486_v33 }
  0x52   :  { %1398 = vmatmul.mubr.bf16.gmra.mxu0 %v1487_v34  ;;  %1430 = vmatmul.mubr.bf16.gmra.mxu1 %v1488_v35 }
  0x53   :  { %1401 = vmatprep.mubr.bf16.mxu0 %v1489_v36  ;;  %1433 = vmatprep.mubr.bf16.mxu1 %v1490_v37 }
  0x5a   :  { %1402 = vmatmul.mubr.bf16.gmra.mxu0 %v1491_v38  ;;  %1434 = vmatmul.mubr.bf16.gmra.mxu1 %v1492_v39 }
  0xe2   :  { %v1375_v41 = vpop.f32.mrf.mxu0  ;;  %v1407_v42 = vpop.f32.mrf.mxu1 }
  0xe3   :  { %v385_v43 = vadd.f32 %v1375_v41, %v1636_v40  ;;  %v513_v44 = vadd.f32 %v1407_v42, %v1636_v40 }
  0xe4   :  { %v376_v45 = vpop.f32.mrf.mxu0  ;;  %v504_v46 = vpop.f32.mrf.mxu1 }
  0xe5   :  { %vm633_vm0 = vcmp.ge.f32.partialorder %v385_v43, 0.0  ;;  %v697_v47 = vmul.f32 0.2, %v385_v43  ;;  %vm665_vm1 = vcmp.ge.f32.partialorder %v513_v44, 0.0  ;;  %v729_v48 = vmul.f32 0.2, %v513_v44 }
  0xe6   :  { %v377_v49 = vadd.f32 %v1636_v40, %v376_v45  ;;  %v505_v50 = vadd.f32 %v1636_v40, %v504_v46  ;;  %v1376_v51 = vpop.f32.mrf.mxu0  ;;  %v1408_v52 = vpop.f32.mrf.mxu1 }
  0xe7   :  { %v761_v53 = vsel %vm633_vm0, %v385_v43, %v697_v47  ;;  %v793_v54 = vsel %vm665_vm1, %v513_v44, %v729_v48  ;;  %v388_v55 = vadd.f32 %v1376_v51, %v1636_v40  ;;  %v516_v56 = vadd.f32 %v1408_v52, %v1636_v40 }
  0xe8   :  { %v1255_v57 = vpack.c.bf16 %v761_v53, %v761_v53  ;;  %v1287_v58 = vpack.c.bf16 %v793_v54, %v793_v54  ;;  %vm631_vm3 = vcmp.ge.f32.partialorder %v377_v49, 0.0  ;;  %v695_v59 = vmul.f32 0.2, %v377_v49  ;;  %v379_v60 = vpop.f32.mrf.mxu0  ;;  %v507_v61 = vpop.f32.mrf.mxu1 }
  0xe9   :  { %vm663_vm4 = vcmp.ge.f32.partialorder %v505_v50, 0.0  ;;  %v727_v62 = vmul.f32 0.2, %v505_v50  ;;  %vm634_vm5 = vcmp.ge.f32.partialorder %v388_v55, 0.0  ;;  %v698_v63 = vmul.f32 0.2, %v388_v55 }
  0xea   :  { %1082 = vst.msk [vmem:[%s1988_s3 + $0x8] sm:$0xf] %vm1079_vm2, %v1255_v57  ;;  %1114 = vst.msk [vmem:[%s1988_s3 + $0x88] sm:$0xf] %vm1079_vm2, %v1287_v58  ;;  %v759_v0 = vsel %vm631_vm3, %v377_v49, %v695_v59  ;;  %vm666_vm6 = vcmp.ge.f32.partialorder %v516_v56, 0.0  ;;  %v380_v2 = vadd.f32 %v1636_v40, %v379_v60  ;;  %v1379_v3 = vpop.f32.mrf.mxu0  ;;  %v1411_v4 = vpop.f32.mrf.mxu1  ;;  %v508_v8 = vadd.f32 %v1636_v40, %v507_v61 }
  0xeb   :  { %v730_v1 = vmul.f32 0.2, %v516_v56  ;;  %v1253_v5 = vpack.c.bf16 %v759_v0, %v759_v0  ;;  %v791_v6 = vsel %vm663_vm4, %v505_v50, %v727_v62  ;;  %v762_v7 = vsel %vm634_vm5, %v388_v55, %v698_v63 }
  0xec   :  { %v1285_v9 = vpack.c.bf16 %v791_v6, %v791_v6  ;;  %v1256_v10 = vpack.c.bf16 %v762_v7, %v762_v7  ;;  %vm632_vm7 = vcmp.ge.f32.partialorder %v380_v2, 0.0  ;;  %v392_v12 = vpop.f32.mrf.mxu0  ;;  %v520_v13 = vpop.f32.mrf.mxu1  ;;  %v696_v15 = vmul.f32 0.2, %v380_v2 }
  0xed   :  { %v794_v11 = vsel %vm666_vm6, %v516_v56, %v730_v1  ;;  %1080 = vst.msk [vmem:[%s1988_s3] sm:$0xf] %vm1079_vm2, %v1253_v5  ;;  %vm664_vm8 = vcmp.ge.f32.partialorder %v508_v8, 0.0  ;;  %v728_v16 = vmul.f32 0.2, %v508_v8  ;;  %v401_v17 = vadd.f32 %v1379_v3, %v1636_v40 }
  0xee   :  { %v1288_v14 = vpack.c.bf16 %v794_v11, %v794_v11  ;;  %1112 = vst.msk [vmem:[%s1988_s3 + $0x80] sm:$0xf] %vm1079_vm2, %v1285_v9  ;;  %1083 = vst.msk [vmem:[%s1988_s3 + $0xc] sm:$0xf] %vm1079_vm2, %v1256_v10  ;;  %v529_v18 = vadd.f32 %v1411_v4, %v1636_v40  ;;  %v393_v19 = vadd.f32 %v1636_v40, %v392_v12  ;;  %v1380_v21 = vpop.f32.mrf.mxu0  ;;  %v1412_v22 = vpop.f32.mrf.mxu1 }
  0xef   :  { %v521_v20 = vadd.f32 %v1636_v40, %v520_v13  ;;  %v760_v23 = vsel %vm632_vm7, %v380_v2, %v696_v15  ;;  %v792_v24 = vsel %vm664_vm8, %v508_v8, %v728_v16  ;;  %v404_v25 = vadd.f32 %v1380_v21, %v1636_v40 }
  0xf0   :  { %1115 = vst.msk [vmem:[%s1988_s3 + $0x8c] sm:$0xf] %vm1079_vm2, %v1288_v14  ;;  %v532_v26 = vadd.f32 %v1412_v22, %v1636_v40  ;;  %v1254_v27 = vpack.c.bf16 %v760_v23, %v760_v23  ;;  %v1286_v28 = vpack.c.bf16 %v792_v24, %v792_v24  ;;  %vm637_vm9 = vcmp.ge.f32.partialorder %v401_v17, 0.0  ;;  %v395_v30 = vpop.f32.mrf.mxu0  ;;  %v523_v31 = vpop.f32.mrf.mxu1 }
  0xf1   :  { %v701_v29 = vmul.f32 0.2, %v401_v17  ;;  %vm669_vm10 = vcmp.ge.f32.partialorder %v529_v18, 0.0  ;;  %v733_v32 = vmul.f32 0.2, %v529_v18  ;;  %vm635_vm11 = vcmp.ge.f32.partialorder %v393_v19, 0.0 }
  0xf2   :  { %v699_v33 = vmul.f32 0.2, %v393_v19  ;;  %1081 = vst.msk [vmem:[%s1988_s3 + $0x4] sm:$0xf] %vm1079_vm2, %v1254_v27  ;;  %1113 = vst.msk [vmem:[%s1988_s3 + $0x84] sm:$0xf] %vm1079_vm2, %v1286_v28  ;;  %v1383_v36 = vpop.f32.mrf.mxu0  ;;  %v1415_v37 = vpop.f32.mrf.mxu1  ;;  %v396_v51 = vadd.f32 %v1636_v40, %v395_v30  ;;  %v524_v53 = vadd.f32 %v1636_v40, %v523_v31 }
  0xf3   :  { %v765_v34 = vsel %vm637_vm9, %v401_v17, %v701_v29  ;;  %vm667_vm12 = vcmp.ge.f32.partialorder %v521_v20, 0.0  ;;  %v731_v35 = vmul.f32 0.2, %v521_v20  ;;  %vm638_vm13 = vcmp.ge.f32.partialorder %v404_v25, 0.0 }
  0xf4   :  { %v1259_v38 = vpack.c.bf16 %v765_v34, %v765_v34  ;;  %v797_v39 = vsel %vm669_vm10, %v529_v18, %v733_v32  ;;  %v763_v41 = vsel %vm635_vm11, %v393_v19, %v699_v33  ;;  %v702_v42 = vmul.f32 0.2, %v404_v25  ;;  %v408_v46 = vpop.f32.mrf.mxu0  ;;  %v536_v47 = vpop.f32.mrf.mxu1 }
  0xf5   :  { %v1291_v43 = vpack.c.bf16 %v797_v39, %v797_v39  ;;  %v1257_v44 = vpack.c.bf16 %v763_v41, %v763_v41  ;;  %v795_v45 = vsel %vm667_vm12, %v521_v20, %v731_v35  ;;  %vm670_vm14 = vcmp.ge.f32.partialorder %v532_v26, 0.0 }
  0xf6   :  { %1086 = vst.msk [vmem:[%s1988_s3 + $0x18] sm:$0xf] %vm1079_vm2, %v1259_v38  ;;  %v1289_v48 = vpack.c.bf16 %v795_v45, %v795_v45  ;;  %v766_v49 = vsel %vm638_vm13, %v404_v25, %v702_v42  ;;  %v734_v50 = vmul.f32 0.2, %v532_v26  ;;  %v417_v54 = vadd.f32 %v1383_v36, %v1636_v40  ;;  %v1384_v56 = vpop.f32.mrf.mxu0  ;;  %v1416_v57 = vpop.f32.mrf.mxu1 }
  0xf7   :  { %1118 = vst.msk [vmem:[%s1988_s3 + $0x98] sm:$0xf] %vm1079_vm2, %v1291_v43  ;;  %1084 = vst.msk [vmem:[%s1988_s3 + $0x10] sm:$0xf] %vm1079_vm2, %v1257_v44  ;;  %v1260_v52 = vpack.c.bf16 %v766_v49, %v766_v49  ;;  %v545_v55 = vadd.f32 %v1415_v37, %v1636_v40  ;;  %vm636_vm15 = vcmp.ge.f32.partialorder %v396_v51, 0.0  ;;  %v409_v60 = vadd.f32 %v1636_v40, %v408_v46 }
  0xf8   :  { %1116 = vst.msk [vmem:[%s1988_s3 + $0x90] sm:$0xf] %vm1079_vm2, %v1289_v48  ;;  %v798_v58 = vsel %vm670_vm14, %v532_v26, %v734_v50  ;;  %v700_v59 = vmul.f32 0.2, %v396_v51  ;;  %vm668_vm0 = vcmp.ge.f32.partialorder %v524_v53, 0.0  ;;  %vm641_vm1 = vcmp.ge.f32.partialorder %v417_v54, 0.0  ;;  %v411_v63 = vpop.f32.mrf.mxu0  ;;  %v539_v0 = vpop.f32.mrf.mxu1 }
  0xf9   :  { %1087 = vst.msk [vmem:[%s1988_s3 + $0x1c] sm:$0xf] %vm1079_vm2, %v1260_v52  ;;  %v1292_v61 = vpack.c.bf16 %v798_v58, %v798_v58  ;;  %v732_v62 = vmul.f32 0.2, %v524_v53  ;;  %v705_v2 = vmul.f32 0.2, %v417_v54  ;;  %v537_v12 = vadd.f32 %v1636_v40, %v536_v47 }
  0xfa   :  { %v764_v1 = vsel %vm636_vm15, %v396_v51, %v700_v59  ;;  %vm673_vm3 = vcmp.ge.f32.partialorder %v545_v55, 0.0  ;;  %v737_v3 = vmul.f32 0.2, %v545_v55  ;;  %vm639_vm4 = vcmp.ge.f32.partialorder %v409_v60, 0.0  ;;  %v1387_v7 = vpop.f32.mrf.mxu0  ;;  %v1419_v8 = vpop.f32.mrf.mxu1 }
  0xfb   :  { %1119 = vst.msk [vmem:[%s1988_s3 + $0x9c] sm:$0xf] %vm1079_vm2, %v1292_v61  ;;  %v1258_v4 = vpack.c.bf16 %v764_v1, %v764_v1  ;;  %v796_v5 = vsel %vm668_vm0, %v524_v53, %v732_v62  ;;  %v703_v6 = vmul.f32 0.2, %v409_v60  ;;  %v769_v10 = vsel %vm641_vm1, %v417_v54, %v705_v2 }
  0xfc   :  { %v1290_v9 = vpack.c.bf16 %v796_v5, %v796_v5  ;;  %v801_v11 = vsel %vm673_vm3, %v545_v55, %v737_v3  ;;  %v1263_v13 = vpack.c.bf16 %v769_v10, %v769_v10  ;;  %v420_v16 = vadd.f32 %v1384_v56, %v1636_v40  ;;  %v424_v17 = vpop.f32.mrf.mxu0  ;;  %v552_v18 = vpop.f32.mrf.mxu1 }
  0xfd   :  { %1085 = vst.msk [vmem:[%s1988_s3 + $0x14] sm:$0xf] %vm1079_vm2, %v1258_v4  ;;  %v1295_v14 = vpack.c.bf16 %v801_v11, %v801_v11  ;;  %v767_v15 = vsel %vm639_vm4, %v409_v60, %v703_v6  ;;  %vm671_vm5 = vcmp.ge.f32.partialorder %v537_v12, 0.0  ;;  %v735_v20 = vmul.f32 0.2, %v537_v12 }
  0xfe   :  { %1117 = vst.msk [vmem:[%s1988_s3 + $0x94] sm:$0xf] %vm1079_vm2, %v1290_v9  ;;  %v1261_v19 = vpack.c.bf16 %v767_v15, %v767_v15  ;;  %v548_v21 = vadd.f32 %v1416_v57, %v1636_v40  ;;  %1090 = vst.msk [vmem:[%s1988_s3 + $0x28] sm:$0xf] %vm1079_vm2, %v1263_v13  ;;  %vm642_vm6 = vcmp.ge.f32.partialorder %v420_v16, 0.0  ;;  %v412_v23 = vadd.f32 %v1636_v40, %v411_v63  ;;  %v1388_v25 = vpop.f32.mrf.mxu0  ;;  %v1420_v26 = vpop.f32.mrf.mxu1 }
  0xff   :  { %1122 = vst.msk [vmem:[%s1988_s3 + $0xa8] sm:$0xf] %vm1079_vm2, %v1295_v14  ;;  %v706_v22 = vmul.f32 0.2, %v420_v16  ;;  %v540_v24 = vadd.f32 %v1636_v40, %v539_v0  ;;  %v799_v27 = vsel %vm671_vm5, %v537_v12, %v735_v20  ;;  %v433_v29 = vadd.f32 %v1387_v7, %v1636_v40 }
 0x100   :  { %1088 = vst.msk [vmem:[%s1988_s3 + $0x20] sm:$0xf] %vm1079_vm2, %v1261_v19  ;;  %vm674_vm7 = vcmp.ge.f32.partialorder %v548_v21, 0.0  ;;  %v738_v28 = vmul.f32 0.2, %v548_v21  ;;  %v1293_v30 = vpack.c.bf16 %v799_v27, %v799_v27  ;;  %vm640_vm8 = vcmp.ge.f32.partialorder %v412_v23, 0.0  ;;  %v427_v33 = vpop.f32.mrf.mxu0  ;;  %v555_v34 = vpop.f32.mrf.mxu1 }
 0x101   :  { %v770_v31 = vsel %vm642_vm6, %v420_v16, %v706_v22  ;;  %v704_v32 = vmul.f32 0.2, %v412_v23  ;;  %vm672_vm9 = vcmp.ge.f32.partialorder %v540_v24, 0.0  ;;  %v736_v37 = vmul.f32 0.2, %v540_v24 }
 0x102   :  { %v1264_v35 = vpack.c.bf16 %v770_v31, %v770_v31  ;;  %v802_v36 = vsel %vm674_vm7, %v548_v21, %v738_v28  ;;  %1120 = vst.msk [vmem:[%s1988_s3 + $0xa0] sm:$0xf] %vm1079_vm2, %v1293_v30  ;;  %vm645_vm10 = vcmp.ge.f32.partialorder %v433_v29, 0.0  ;;  %v709_v41 = vmul.f32 0.2, %v433_v29  ;;  %v1391_v42 = vpop.f32.mrf.mxu0  ;;  %v1423_v43 = vpop.f32.mrf.mxu1 }
 0x103   :  { %v1296_v38 = vpack.c.bf16 %v802_v36, %v802_v36  ;;  %v768_v39 = vsel %vm640_vm8, %v412_v23, %v704_v32  ;;  %v800_v45 = vsel %vm672_vm9, %v540_v24, %v736_v37  ;;  %v561_v46 = vadd.f32 %v1419_v8, %v1636_v40 }
 0x104   :  { %1091 = vst.msk [vmem:[%s1988_s3 + $0x2c] sm:$0xf] %vm1079_vm2, %v1264_v35  ;;  %v1262_v44 = vpack.c.bf16 %v768_v39, %v768_v39  ;;  %v425_v47 = vadd.f32 %v1636_v40, %v424_v17  ;;  %v1294_v48 = vpack.c.bf16 %v800_v45, %v800_v45  ;;  %v773_v49 = vsel %vm645_vm10, %v433_v29, %v709_v41  ;;  %v440_v52 = vpop.f32.mrf.mxu0  ;;  %v568_v53 = vpop.f32.mrf.mxu1 }
 0x105   :  { %1123 = vst.msk [vmem:[%s1988_s3 + $0xac] sm:$0xf] %vm1079_vm2, %v1296_v38  ;;  %v553_v50 = vadd.f32 %v1636_v40, %v552_v18  ;;  %v436_v51 = vadd.f32 %v1388_v25, %v1636_v40  ;;  %v1267_v54 = vpack.c.bf16 %v773_v49, %v773_v49  ;;  %vm677_vm11 = vcmp.ge.f32.partialorder %v561_v46, 0.0 }
 0x106   :  { %1089 = vst.msk [vmem:[%s1988_s3 + $0x24] sm:$0xf] %vm1079_vm2, %v1262_v44  ;;  %v741_v55 = vmul.f32 0.2, %v561_v46  ;;  %vm643_vm12 = vcmp.ge.f32.partialorder %v425_v47, 0.0  ;;  %v1392_v58 = vpop.f32.mrf.mxu0  ;;  %v1424_v59 = vpop.f32.mrf.mxu1  ;;  %v564_v62 = vadd.f32 %v1420_v26, %v1636_v40  ;;  %v428_v63 = vadd.f32 %v1636_v40, %v427_v33 }
 0x107   :  { %1121 = vst.msk [vmem:[%s1988_s3 + $0xa4] sm:$0xf] %vm1079_vm2, %v1294_v48  ;;  %v707_v56 = vmul.f32 0.2, %v425_v47  ;;  %vm675_vm13 = vcmp.ge.f32.partialorder %v553_v50, 0.0  ;;  %vm646_vm14 = vcmp.ge.f32.partialorder %v436_v51, 0.0  ;;  %v556_v3 = vadd.f32 %v1636_v40, %v555_v34 }
 0x108   :  { %v739_v57 = vmul.f32 0.2, %v553_v50  ;;  %1094 = vst.msk [vmem:[%s1988_s3 + $0x38] sm:$0xf] %vm1079_vm2, %v1267_v54  ;;  %v805_v60 = vsel %vm677_vm11, %v561_v46, %v741_v55  ;;  %v710_v61 = vmul.f32 0.2, %v436_v51  ;;  %v1772_v4 = vpop.f32.mrf.mxu0  ;;  %v1774_v5 = vpop.f32.mrf.mxu1  ;;  %v449_v15 = vadd.f32 %v1391_v42, %v1636_v40 }
 0x109   :  { %v1299_v0 = vpack.c.bf16 %v805_v60, %v805_v60  ;;  %v771_v1 = vsel %vm643_vm12, %v425_v47, %v707_v56  ;;  %vm678_vm15 = vcmp.ge.f32.partialorder %v564_v62, 0.0  ;;  %v742_v10 = vmul.f32 0.2, %v564_v62 }
 0x10a   :  { %v803_v2 = vsel %vm675_vm13, %v553_v50, %v739_v57  ;;  %v1265_v6 = vpack.c.bf16 %v771_v1, %v771_v1  ;;  %v774_v8 = vsel %vm646_vm14, %v436_v51, %v710_v61  ;;  %vm644_vm0 = vcmp.ge.f32.partialorder %v428_v63, 0.0  ;;  %v1395_v12 = vpop.f32.mrf.mxu0  ;;  %v1427_v13 = vpop.f32.mrf.mxu1 }
 0x10b   :  { %v1297_v7 = vpack.c.bf16 %v803_v2, %v803_v2  ;;  %1126 = vst.msk [vmem:[%s1988_s3 + $0xb8] sm:$0xf] %vm1079_vm2, %v1299_v0  ;;  %v1268_v9 = vpack.c.bf16 %v774_v8, %v774_v8  ;;  %v708_v11 = vmul.f32 0.2, %v428_v63  ;;  %vm676_vm1 = vcmp.ge.f32.partialorder %v556_v3, 0.0 }
 0x10c   :  { %1092 = vst.msk [vmem:[%s1988_s3 + $0x30] sm:$0xf] %vm1079_vm2, %v1265_v6  ;;  %v740_v14 = vmul.f32 0.2, %v556_v3  ;;  %v577_v16 = vadd.f32 %v1423_v43, %v1636_v40  ;;  %v806_v17 = vsel %vm678_vm15, %v564_v62, %v742_v10  ;;  %v441_v19 = vadd.f32 %v1636_v40, %v440_v52  ;;  %v456_v21 = vpop.f32.mrf.mxu0  ;;  %v1797_v22 = vpop.f32.mrf.mxu1 }
 0x10d   :  { %1124 = vst.msk [vmem:[%s1988_s3 + $0xb0] sm:$0xf] %vm1079_vm2, %v1297_v7  ;;  %1095 = vst.msk [vmem:[%s1988_s3 + $0x3c] sm:$0xf] %vm1079_vm2, %v1268_v9  ;;  %v772_v18 = vsel %vm644_vm0, %v428_v63, %v708_v11  ;;  %v569_v20 = vadd.f32 %v1636_v40, %v568_v53  ;;  %v1300_v23 = vpack.c.bf16 %v806_v17, %v806_v17  ;;  %vm649_vm3 = vcmp.ge.f32.partialorder %v449_v15, 0.0 }
 0x10e   :  { %v1266_v24 = vpack.c.bf16 %v772_v18, %v772_v18  ;;  %v804_v25 = vsel %vm676_vm1, %v556_v3, %v740_v14  ;;  %v713_v27 = vmul.f32 0.2, %v449_v15  ;;  %vm681_vm4 = vcmp.ge.f32.partialorder %v577_v16, 0.0  ;;  %v1799_v29 = vpop.f32.mrf.mxu0  ;;  %v1801_v30 = vpop.f32.mrf.mxu1 }
 0x10f   :  { %v1298_v26 = vpack.c.bf16 %v804_v25, %v804_v25  ;;  %v745_v28 = vmul.f32 0.2, %v577_v16  ;;  %1127 = vst.msk [vmem:[%s1988_s3 + $0xbc] sm:$0xf] %vm1079_vm2, %v1300_v23  ;;  %vm647_vm5 = vcmp.ge.f32.partialorder %v441_v19, 0.0  ;;  %vm679_vm6 = vcmp.ge.f32.partialorder %v569_v20, 0.0 }
 0x110   :  { %1093 = vst.msk [vmem:[%s1988_s3 + $0x34] sm:$0xf] %vm1079_vm2, %v1266_v24  ;;  %v711_v31 = vmul.f32 0.2, %v441_v19  ;;  %v743_v32 = vmul.f32 0.2, %v569_v20  ;;  %v777_v33 = vsel %vm649_vm3, %v449_v15, %v713_v27  ;;  %v452_v35 = vadd.f32 %v1392_v58, %v1636_v40  ;;  %v1817_v37 = vpop.f32.mrf.mxu0  ;;  %v1819_v38 = vpop.f32.mrf.mxu1 }
 0x111   :  { %1125 = vst.msk [vmem:[%s1988_s3 + $0xb4] sm:$0xf] %vm1079_vm2, %v1298_v26  ;;  %v809_v34 = vsel %vm681_vm4, %v577_v16, %v745_v28  ;;  %v580_v36 = vadd.f32 %v1424_v59, %v1636_v40  ;;  %v1271_v39 = vpack.c.bf16 %v777_v33, %v777_v33  ;;  %v444_v50 = vadd.f32 %v1636_v40, %v1772_v4 }
 0x112   :  { %v1303_v41 = vpack.c.bf16 %v809_v34, %v809_v34  ;;  %v775_v42 = vsel %vm647_vm5, %v441_v19, %v711_v31  ;;  %v807_v43 = vsel %vm679_vm6, %v569_v20, %v743_v32  ;;  %vm650_vm7 = vcmp.ge.f32.partialorder %v452_v35, 0.0  ;;  %v1399_v47 = vpop.f32.mrf.mxu0  ;;  %v1821_v48 = vpop.f32.mrf.mxu1 }
 0x113   :  { %v1269_v44 = vpack.c.bf16 %v775_v42, %v775_v42  ;;  %v1301_v45 = vpack.c.bf16 %v807_v43, %v807_v43  ;;  %v714_v46 = vmul.f32 0.2, %v452_v35  ;;  %1098 = vst.msk [vmem:[%s1988_s3 + $0x48] sm:$0xf] %vm1079_vm2, %v1271_v39  ;;  %vm682_vm8 = vcmp.ge.f32.partialorder %v580_v36, 0.0 }
 0x114   :  { %1130 = vst.msk [vmem:[%s1988_s3 + $0xc8] sm:$0xf] %vm1079_vm2, %v1303_v41  ;;  %v746_v49 = vmul.f32 0.2, %v580_v36  ;;  %v572_v51 = vadd.f32 %v1636_v40, %v1774_v5  ;;  %v465_v53 = vadd.f32 %v1395_v12, %v1636_v40  ;;  %v593_v54 = vadd.f32 %v1427_v13, %v1636_v40  ;;  %v472_v61 = vpop.f32.mrf.mxu0  ;;  %v600_v62 = vpop.f32.mrf.mxu1 }
 0x115   :  { %1096 = vst.msk [vmem:[%s1988_s3 + $0x40] sm:$0xf] %vm1079_vm2, %v1269_v44  ;;  %1128 = vst.msk [vmem:[%s1988_s3 + $0xc0] sm:$0xf] %vm1079_vm2, %v1301_v45  ;;  %v778_v52 = vsel %vm650_vm7, %v452_v35, %v714_v46  ;;  %v457_v55 = vadd.f32 %v1636_v40, %v456_v21  ;;  %vm648_vm9 = vcmp.ge.f32.partialorder %v444_v50, 0.0  ;;  %v585_v8 = vadd.f32 %v1636_v40, %v1797_v22 }
 0x116   :  { %v1272_v56 = vpack.c.bf16 %v778_v52, %v778_v52  ;;  %v810_v57 = vsel %vm682_vm8, %v580_v36, %v746_v49  ;;  %v712_v58 = vmul.f32 0.2, %v444_v50  ;;  %vm680_vm10 = vcmp.ge.f32.partialorder %v572_v51, 0.0  ;;  %v1400_v13 = vpop.f32.mrf.mxu0  ;;  %v1432_v14 = vpop.f32.mrf.mxu1 }
 0x117   :  { %v1304_v59 = vpack.c.bf16 %v810_v57, %v810_v57  ;;  %v744_v60 = vmul.f32 0.2, %v572_v51  ;;  %vm653_vm11 = vcmp.ge.f32.partialorder %v465_v53, 0.0  ;;  %v717_v0 = vmul.f32 0.2, %v465_v53 }
 0x118   :  { %1099 = vst.msk [vmem:[%s1988_s3 + $0x4c] sm:$0xf] %vm1079_vm2, %v1272_v56  ;;  %v776_v63 = vsel %vm648_vm9, %v444_v50, %v712_v58  ;;  %vm685_vm12 = vcmp.ge.f32.partialorder %v593_v54, 0.0  ;;  %v749_v1 = vmul.f32 0.2, %v593_v54  ;;  %vm651_vm13 = vcmp.ge.f32.partialorder %v457_v55, 0.0  ;;  %v475_v27 = vpop.f32.mrf.mxu0  ;;  %v603_v28 = vpop.f32.mrf.mxu1 }
 0x119   :  { %1131 = vst.msk [vmem:[%s1988_s3 + $0xcc] sm:$0xf] %vm1079_vm2, %v1304_v59  ;;  %v1270_v2 = vpack.c.bf16 %v776_v63, %v776_v63  ;;  %v808_v3 = vsel %vm680_vm10, %v572_v51, %v744_v60  ;;  %v715_v4 = vmul.f32 0.2, %v457_v55  ;;  %v781_v6 = vsel %vm653_vm11, %v465_v53, %v717_v0 }
 0x11a   :  { %v1302_v5 = vpack.c.bf16 %v808_v3, %v808_v3  ;;  %v813_v7 = vsel %vm685_vm12, %v593_v54, %v749_v1  ;;  %v1275_v9 = vpack.c.bf16 %v781_v6, %v781_v6  ;;  %v468_v12 = vadd.f32 %v1799_v29, %v1636_v40  ;;  %v1403_v44 = vpop.f32.mrf.mxu0  ;;  %v1435_v45 = vpop.f32.mrf.mxu1 }
 0x11b   :  { %1097 = vst.msk [vmem:[%s1988_s3 + $0x44] sm:$0xf] %vm1079_vm2, %v1270_v2  ;;  %v1307_v10 = vpack.c.bf16 %v813_v7, %v813_v7  ;;  %v779_v11 = vsel %vm651_vm13, %v457_v55, %v715_v4  ;;  %vm683_vm14 = vcmp.ge.f32.partialorder %v585_v8, 0.0  ;;  %v747_v16 = vmul.f32 0.2, %v585_v8 }
 0x11c   :  { %1129 = vst.msk [vmem:[%s1988_s3 + $0xc4] sm:$0xf] %vm1079_vm2, %v1302_v5  ;;  %v1273_v15 = vpack.c.bf16 %v779_v11, %v779_v11  ;;  %v596_v17 = vadd.f32 %v1801_v30, %v1636_v40  ;;  %1102 = vst.msk [vmem:[%s1988_s3 + $0x58] sm:$0xf] %vm1079_vm2, %v1275_v9  ;;  %vm654_vm15 = vcmp.ge.f32.partialorder %v468_v12, 0.0  ;;  %v460_v19 = vadd.f32 %v1636_v40, %v1817_v37  ;;  %v488_v58 = vpop.f32.mrf.mxu0  ;;  %v616_v59 = vpop.f32.mrf.mxu1 }
 0x11d   :  { %1134 = vst.msk [vmem:[%s1988_s3 + $0xd8] sm:$0xf] %vm1079_vm2, %v1307_v10  ;;  %v718_v18 = vmul.f32 0.2, %v468_v12  ;;  %v588_v20 = vadd.f32 %v1636_v40, %v1819_v38  ;;  %v811_v21 = vsel %vm683_vm14, %v585_v8, %v747_v16  ;;  %v481_v23 = vadd.f32 %v1399_v47, %v1636_v40 }
 0x11e   :  { %1100 = vst.msk [vmem:[%s1988_s3 + $0x50] sm:$0xf] %vm1079_vm2, %v1273_v15  ;;  %vm686_vm0 = vcmp.ge.f32.partialorder %v596_v17, 0.0  ;;  %v750_v22 = vmul.f32 0.2, %v596_v17  ;;  %v1305_v24 = vpack.c.bf16 %v811_v21, %v811_v21  ;;  %vm652_vm1 = vcmp.ge.f32.partialorder %v460_v19, 0.0  ;;  %v1404_v9 = vpop.f32.mrf.mxu0  ;;  %v1436_v10 = vpop.f32.mrf.mxu1 }
 0x11f   :  { %v782_v25 = vsel %vm654_vm15, %v468_v12, %v718_v18  ;;  %v716_v26 = vmul.f32 0.2, %v460_v19  ;;  %vm684_vm3 = vcmp.ge.f32.partialorder %v588_v20, 0.0  ;;  %v748_v31 = vmul.f32 0.2, %v588_v20 }
 0x120   :  { %v1276_v29 = vpack.c.bf16 %v782_v25, %v782_v25  ;;  %v814_v30 = vsel %vm686_vm0, %v596_v17, %v750_v22  ;;  %1132 = vst.msk [vmem:[%s1988_s3 + $0xd0] sm:$0xf] %vm1079_vm2, %v1305_v24  ;;  %vm657_vm4 = vcmp.ge.f32.partialorder %v481_v23, 0.0  ;;  %v721_v34 = vmul.f32 0.2, %v481_v23  ;;  %v619_v24 = vpop.f32.mrf.mxu1 }
 0x121   :  { %v1308_v32 = vpack.c.bf16 %v814_v30, %v814_v30  ;;  %v780_v33 = vsel %vm652_vm1, %v460_v19, %v716_v26  ;;  %v812_v36 = vsel %vm684_vm3, %v588_v20, %v748_v31  ;;  %v609_v37 = vadd.f32 %v1821_v48, %v1636_v40 }
 0x122   :  { %1103 = vst.msk [vmem:[%s1988_s3 + $0x5c] sm:$0xf] %vm1079_vm2, %v1276_v29  ;;  %v1274_v35 = vpack.c.bf16 %v780_v33, %v780_v33  ;;  %v473_v38 = vadd.f32 %v1636_v40, %v472_v61  ;;  %v1306_v39 = vpack.c.bf16 %v812_v36, %v812_v36  ;;  %v785_v41 = vsel %vm657_vm4, %v481_v23, %v721_v34  ;;  %v491_v23 = vpop.f32.mrf.mxu0 }
 0x123   :  { %1135 = vst.msk [vmem:[%s1988_s3 + $0xdc] sm:$0xf] %vm1079_vm2, %v1308_v32  ;;  %v601_v42 = vadd.f32 %v1636_v40, %v600_v62  ;;  %v484_v43 = vadd.f32 %v1400_v13, %v1636_v40  ;;  %v1279_v46 = vpack.c.bf16 %v785_v41, %v785_v41  ;;  %vm689_vm5 = vcmp.ge.f32.partialorder %v609_v37, 0.0 }
 0x124   :  { %1101 = vst.msk [vmem:[%s1988_s3 + $0x54] sm:$0xf] %vm1079_vm2, %v1274_v35  ;;  %v753_v47 = vmul.f32 0.2, %v609_v37  ;;  %vm655_vm6 = vcmp.ge.f32.partialorder %v473_v38, 0.0  ;;  %v612_v52 = vadd.f32 %v1432_v14, %v1636_v40  ;;  %v476_v53 = vadd.f32 %v1636_v40, %v475_v27 }
 0x125   :  { %1133 = vst.msk [vmem:[%s1988_s3 + $0xd4] sm:$0xf] %vm1079_vm2, %v1306_v39  ;;  %v719_v48 = vmul.f32 0.2, %v473_v38  ;;  %vm687_vm7 = vcmp.ge.f32.partialorder %v601_v42, 0.0  ;;  %vm658_vm8 = vcmp.ge.f32.partialorder %v484_v43, 0.0  ;;  %v604_v57 = vadd.f32 %v1636_v40, %v603_v28 }
 0x126   :  { %v751_v49 = vmul.f32 0.2, %v601_v42  ;;  %1106 = vst.msk [vmem:[%s1988_s3 + $0x68] sm:$0xf] %vm1079_vm2, %v1279_v46  ;;  %v817_v50 = vsel %vm689_vm5, %v609_v37, %v753_v47  ;;  %v722_v51 = vmul.f32 0.2, %v484_v43  ;;  %v497_v3 = vadd.f32 %v1403_v44, %v1636_v40 }
 0x127   :  { %v1311_v54 = vpack.c.bf16 %v817_v50, %v817_v50  ;;  %v783_v55 = vsel %vm655_vm6, %v473_v38, %v719_v48  ;;  %vm690_vm9 = vcmp.ge.f32.partialorder %v612_v52, 0.0  ;;  %v754_v0 = vmul.f32 0.2, %v612_v52 }
 0x128   :  { %v815_v56 = vsel %vm687_vm7, %v601_v42, %v751_v49  ;;  %v1277_v60 = vpack.c.bf16 %v783_v55, %v783_v55  ;;  %v786_v62 = vsel %vm658_vm8, %v484_v43, %v722_v51  ;;  %vm656_vm10 = vcmp.ge.f32.partialorder %v476_v53, 0.0 }
 0x129   :  { %v1309_v61 = vpack.c.bf16 %v815_v56, %v815_v56  ;;  %1138 = vst.msk [vmem:[%s1988_s3 + $0xe8] sm:$0xf] %vm1079_vm2, %v1311_v54  ;;  %v1280_v63 = vpack.c.bf16 %v786_v62, %v786_v62  ;;  %v720_v1 = vmul.f32 0.2, %v476_v53  ;;  %vm688_vm11 = vcmp.ge.f32.partialorder %v604_v57, 0.0 }
 0x12a   :  { %1104 = vst.msk [vmem:[%s1988_s3 + $0x60] sm:$0xf] %vm1079_vm2, %v1277_v60  ;;  %v752_v2 = vmul.f32 0.2, %v604_v57  ;;  %v625_v4 = vadd.f32 %v1435_v45, %v1636_v40  ;;  %v818_v5 = vsel %vm690_vm9, %v612_v52, %v754_v0  ;;  %v489_v7 = vadd.f32 %v1636_v40, %v488_v58 }
 0x12b   :  { %1136 = vst.msk [vmem:[%s1988_s3 + $0xe0] sm:$0xf] %vm1079_vm2, %v1309_v61  ;;  %1107 = vst.msk [vmem:[%s1988_s3 + $0x6c] sm:$0xf] %vm1079_vm2, %v1280_v63  ;;  %v784_v6 = vsel %vm656_vm10, %v476_v53, %v720_v1  ;;  %v617_v8 = vadd.f32 %v1636_v40, %v616_v59  ;;  %v1312_v11 = vpack.c.bf16 %v818_v5, %v818_v5  ;;  %vm661_vm12 = vcmp.ge.f32.partialorder %v497_v3, 0.0 }
 0x12c   :  { %v1278_v12 = vpack.c.bf16 %v784_v6, %v784_v6  ;;  %v816_v13 = vsel %vm688_vm11, %v604_v57, %v752_v2  ;;  %v725_v15 = vmul.f32 0.2, %v497_v3  ;;  %vm693_vm13 = vcmp.ge.f32.partialorder %v625_v4, 0.0 }
 0x12d   :  { %v1310_v14 = vpack.c.bf16 %v816_v13, %v816_v13  ;;  %v757_v16 = vmul.f32 0.2, %v625_v4  ;;  %1139 = vst.msk [vmem:[%s1988_s3 + $0xec] sm:$0xf] %vm1079_vm2, %v1312_v11  ;;  %vm659_vm14 = vcmp.ge.f32.partialorder %v489_v7, 0.0  ;;  %vm691_vm15 = vcmp.ge.f32.partialorder %v617_v8, 0.0 }
 0x12e   :  { %1105 = vst.msk [vmem:[%s1988_s3 + $0x64] sm:$0xf] %vm1079_vm2, %v1278_v12  ;;  %v723_v17 = vmul.f32 0.2, %v489_v7  ;;  %v755_v18 = vmul.f32 0.2, %v617_v8  ;;  %v789_v19 = vsel %vm661_vm12, %v497_v3, %v725_v15  ;;  %v500_v21 = vadd.f32 %v1404_v9, %v1636_v40 }
 0x12f   :  { %1137 = vst.msk [vmem:[%s1988_s3 + $0xe4] sm:$0xf] %vm1079_vm2, %v1310_v14  ;;  %v821_v20 = vsel %vm693_vm13, %v625_v4, %v757_v16  ;;  %v628_v22 = vadd.f32 %v1436_v10, %v1636_v40  ;;  %v1283_v25 = vpack.c.bf16 %v789_v19, %v789_v19  ;;  %v492_v33 = vadd.f32 %v1636_v40, %v491_v23 }
 0x130   :  { %v1315_v26 = vpack.c.bf16 %v821_v20, %v821_v20  ;;  %v787_v27 = vsel %vm659_vm14, %v489_v7, %v723_v17  ;;  %v819_v28 = vsel %vm691_vm15, %v617_v8, %v755_v18  ;;  %vm662_vm0 = vcmp.ge.f32.partialorder %v500_v21, 0.0 }
 0x131   :  { %v1281_v29 = vpack.c.bf16 %v787_v27, %v787_v27  ;;  %v1313_v30 = vpack.c.bf16 %v819_v28, %v819_v28  ;;  %v726_v31 = vmul.f32 0.2, %v500_v21  ;;  %1110 = vst.msk [vmem:[%s1988_s3 + $0x78] sm:$0xf] %vm1079_vm2, %v1283_v25  ;;  %vm694_vm1 = vcmp.ge.f32.partialorder %v628_v22, 0.0 }
 0x132   :  { %1142 = vst.msk [vmem:[%s1988_s3 + $0xf8] sm:$0xf] %vm1079_vm2, %v1315_v26  ;;  %v758_v32 = vmul.f32 0.2, %v628_v22  ;;  %v620_v34 = vadd.f32 %v1636_v40, %v619_v24  ;;  %vm660_vm3 = vcmp.ge.f32.partialorder %v492_v33, 0.0 }
 0x133   :  { %1108 = vst.msk [vmem:[%s1988_s3 + $0x70] sm:$0xf] %vm1079_vm2, %v1281_v29  ;;  %1140 = vst.msk [vmem:[%s1988_s3 + $0xf0] sm:$0xf] %vm1079_vm2, %v1313_v30  ;;  %v790_v35 = vsel %vm662_vm0, %v500_v21, %v726_v31  ;;  %v724_v38 = vmul.f32 0.2, %v492_v33 }
 0x134   :  { %v1284_v36 = vpack.c.bf16 %v790_v35, %v790_v35  ;;  %v822_v37 = vsel %vm694_vm1, %v628_v22, %v758_v32  ;;  %vm692_vm4 = vcmp.ge.f32.partialorder %v620_v34, 0.0  ;;  %v756_v41 = vmul.f32 0.2, %v620_v34 }
 0x135   :  { %v1316_v39 = vpack.c.bf16 %v822_v37, %v822_v37  ;;  %v788_v40 = vsel %vm660_vm3, %v492_v33, %v724_v38 }
 0x136   :  { %1111 = vst.msk [vmem:[%s1988_s3 + $0x7c] sm:$0xf] %vm1079_vm2, %v1284_v36  ;;  %v1282_v42 = vpack.c.bf16 %v788_v40, %v788_v40  ;;  %v820_v43 = vsel %vm692_vm4, %v620_v34, %v756_v41 }
 0x137   :  { %1143 = vst.msk [vmem:[%s1988_s3 + $0xfc] sm:$0xf] %vm1079_vm2, %v1316_v39  ;;  %v1314_v44 = vpack.c.bf16 %v820_v43, %v820_v43 }
 0x138   :  { %1109 = vst.msk [vmem:[%s1988_s3 + $0x74] sm:$0xf] %vm1079_vm2, %v1282_v42 }
 0x139   :  { %1141 = vst.msk [vmem:[%s1988_s3 + $0xf4] sm:$0xf] %vm1079_vm2, %v1314_v44 }

// kernel: nlayer_discriminator_forward.6
= control target key start
LH: loop header
LB: loop body
LE: loop exit
PB: predicated region body
PF: predicated region fallthrough
CT: control target
= control target key end

     0   :  { %vm249_vm0 = vcmask 130048   ;;  %v563_v16 = vmov 0.0   ;;  %vm408_vm1 = vcmask 125952   ;;  %vm288_vm2 = vcmask 122880   ;;  %s785_s1 = inlined_call_operand.vmem [shape: bf16[128,128], index: 1, kind: input, shape index: {}]   ;;  %s786_s0 = inlined_call_operand.vmem [shape: bf16[128,128], index: 0, kind: input, shape index: {}]   ;;  %s787_s4 = inlined_call_operand.vmem [shape: f32[8,16], index: 4, kind: output, shape index: {1}]   ;;  %s788_s2 = inlined_call_operand.vmem [shape: f32[1,128], index: 2, kind: input, shape index: {}]   ;;  %s789_s3 = inlined_call_operand.vmem [shape: bf16[128,16], index: 3, kind: output, shape index: {0}]  }
   0x1   :  { %v547_v0 = vld [vmem:[%s785_s1 + $0x38] sm:$0xff]   ;;  %v548_v1 = vld [vmem:[%s785_s1 + $0x30] sm:$0xff]   ;;  %v549_v2 = vld [vmem:[%s785_s1 + $0x28] sm:$0xff]   ;;  %250 = vst.msk [vmem:[%s787_s4] sm:$0xff] %vm249_vm0, %v563_v16 }
   0x2   :  { %498 = vmatprep.subr.bf16.mxu0 %v547_v0  ;;  %530 = vmatprep.subr.bf16.mxu1 %v547_v0  ;;  %v550_v3 = vld [vmem:[%s785_s1 + $0x20] sm:$0xff]   ;;  %v551_v5 = vld [vmem:[%s785_s1 + $0x18] sm:$0xff]   ;;  %v552_v7 = vld [vmem:[%s785_s1 + $0x10] sm:$0xff]  }
   0x3   :  { %499 = vmatpush3.bf16.msra.mxu0 %v547_v0  ;;  %538 = vmatpush3.bf16.msra.mxu1 %v547_v0  ;;  %v555_v4 = vld [vmem:[%s786_s0] sm:$0xff]   ;;  %v553_v8 = vld [vmem:[%s785_s1 + $0x8] sm:$0xff]   ;;  %v557_v12 = vld [vmem:[%s786_s0 + $0x10] sm:$0xff]  }
   0x4   :  { %500 = vmatprep.subr.bf16.mxu0 %v548_v1  ;;  %531 = vmatprep.subr.bf16.mxu1 %v548_v1  ;;  %v559_v6 = vld [vmem:[%s786_s0 + $0x20] sm:$0xff]   ;;  %v556_v10 = vld [vmem:[%s786_s0 + $0x8] sm:$0xff]   ;;  %v561_v13 = vld [vmem:[%s786_s0 + $0x30] sm:$0xff]  }
   0x5   :  { %514 = vmatprep.mubr.bf16.mxu0 %v555_v4  ;;  %522 = vmatprep.mubr.bf16.mxu1 %v559_v6  ;;  %v554_v9 = vld [vmem:[%s785_s1] sm:$0xff]   ;;  %v560_v11 = vld [vmem:[%s786_s0 + $0x28] sm:$0xff]   ;;  %v558_v14 = vld [vmem:[%s786_s0 + $0x18] sm:$0xff]  }
   0x6   :  { %v562_v15 = vld [vmem:[%s786_s0 + $0x38] sm:$0xff]   ;;  %v644_v17 = vld [vmem:[%s788_s2] ss:$0 sm:$0xff] }
   0x7   :  { %501 = vmatpush3.bf16.msra.mxu0 %v548_v1  ;;  %539 = vmatpush3.bf16.msra.mxu1 %v548_v1 }
   0x8   :  { %502 = vmatprep.subr.bf16.mxu0 %v549_v2  ;;  %532 = vmatprep.subr.bf16.mxu1 %v549_v2 }
   0xb   :  { %503 = vmatpush3.bf16.msra.mxu0 %v549_v2  ;;  %540 = vmatpush3.bf16.msra.mxu1 %v549_v2 }
   0xc   :  { %504 = vmatprep.subr.bf16.mxu0 %v550_v3  ;;  %533 = vmatprep.subr.bf16.mxu1 %v550_v3 }
   0xf   :  { %505 = vmatpush3.bf16.msra.mxu0 %v550_v3  ;;  %541 = vmatpush3.bf16.msra.mxu1 %v550_v3 }
  0x10   :  { %506 = vmatprep.subr.bf16.mxu0 %v551_v5  ;;  %534 = vmatprep.subr.bf16.mxu1 %v551_v5 }
  0x13   :  { %507 = vmatpush3.bf16.msra.mxu0 %v551_v5  ;;  %542 = vmatpush3.bf16.msra.mxu1 %v551_v5 }
  0x14   :  { %508 = vmatprep.subr.bf16.mxu0 %v552_v7  ;;  %535 = vmatprep.subr.bf16.mxu1 %v552_v7 }
  0x17   :  { %509 = vmatpush3.bf16.msra.mxu0 %v552_v7  ;;  %543 = vmatpush3.bf16.msra.mxu1 %v552_v7 }
  0x18   :  { %510 = vmatprep.subr.bf16.mxu0 %v553_v8  ;;  %536 = vmatprep.subr.bf16.mxu1 %v553_v8 }
  0x1b   :  { %511 = vmatpush3.bf16.msra.mxu0 %v553_v8  ;;  %544 = vmatpush3.bf16.msra.mxu1 %v553_v8 }
  0x1c   :  { %512 = vmatprep.subr.bf16.mxu0 %v554_v9  ;;  %537 = vmatprep.subr.bf16.mxu1 %v554_v9 }
  0x1f   :  { %513 = vmatpush3.bf16.msra.mxu0 %v554_v9  ;;  %545 = vmatpush3.bf16.msra.mxu1 %v554_v9 }
  0x22   :  { %515 = vmatmul.mubr.bf16.vlgmr.msra.gmra.mxu0 %v556_v10  ;;  %523 = vmatmul.mubr.bf16.vlgmr.msra.gmra.mxu1 %v560_v11 }
  0x23   :  { %518 = vmatprep.mubr.bf16.mxu0 %v557_v12  ;;  %526 = vmatprep.mubr.bf16.mxu1 %v561_v13 }
  0x2a   :  { %519 = vmatmul.mubr.bf16.gmra.mxu0 %v558_v14  ;;  %527 = vmatmul.mubr.bf16.gmra.mxu1 %v562_v15 }
  0xe2   :  { %v516_v18 = vpop.f32.mrf.mxu0  ;;  %v524_v19 = vpop.f32.mrf.mxu1 }
  0xe3   :  { %v195_v20 = vadd.f32 %v516_v18, %v644_v17  ;;  %v648_v21 = vadd.f32 %v524_v19, %v644_v17 }
  0xe4   :  { %v186_v22 = vpop.f32.mrf.mxu0  ;;  %v218_v23 = vpop.f32.mrf.mxu1 }
  0xe5   :  { %v468_v24 = vpack.c.bf16 %v195_v20, %v195_v20  ;;  %v187_v25 = vadd.f32 %v644_v17, %v186_v22  ;;  %v476_v27 = vpack.c.bf16 %v648_v21, %v648_v21  ;;  %v654_v28 = vadd.f32 %v644_v17, %v218_v23 }
  0xe6   :  { %v517_v26 = vpop.f32.mrf.mxu0  ;;  %v525_v29 = vpop.f32.mrf.mxu1  ;;  %v292_v37 = vmul.f32 %v195_v20, %v195_v20  ;;  %v254_v47 = vsel %vm249_vm0, %v195_v20, 0.0 }
  0xe7   :  { %411 = vst.msk [vmem:[%s789_s3 + $0x8] sm:$0xf] %vm408_vm1, %v468_v24  ;;  %v466_v30 = vpack.c.bf16 %v187_v25, %v187_v25  ;;  %v198_v31 = vadd.f32 %v517_v26, %v644_v17  ;;  %419 = vst.msk [vmem:[%s789_s3 + $0x28] sm:$0xf] %vm408_vm1, %v476_v27  ;;  %v290_v34 = vmul.f32 %v187_v25, %v187_v25  ;;  %v251_v38 = vsel %vm249_vm0, %v187_v25, 0.0 }
  0xe8   :  { %v189_v32 = vpop.f32.mrf.mxu0  ;;  %v221_v33 = vpop.f32.mrf.mxu1  ;;  %v474_v36 = vpack.c.bf16 %v654_v28, %v654_v28  ;;  %v674_v41 = vadd.f32 %v525_v29, %v644_v17  ;;  %v309_v55 = vsel %vm249_vm0, %v292_v37, 0.0 }
  0xe9   :  { %409 = vst.msk [vmem:[%s789_s3] sm:$0xf] %vm408_vm1, %v466_v30  ;;  %v190_v35 = vadd.f32 %v644_v17, %v189_v32  ;;  %v469_v39 = vpack.c.bf16 %v198_v31, %v198_v31  ;;  %v306_v51 = vsel %vm249_vm0, %v290_v34, 0.0  ;;  %v293_v52 = vmul.f32 %v198_v31, %v198_v31 }
  0xea   :  { %v520_v40 = vpop.f32.mrf.mxu0  ;;  %v528_v42 = vpop.f32.mrf.mxu1  ;;  %417 = vst.msk [vmem:[%s789_s3 + $0x20] sm:$0xf] %vm408_vm1, %v474_v36  ;;  %v256_v60 = vsel %vm249_vm0, %v198_v31, 0.0  ;;  %v477_v62 = vpack.c.bf16 %v674_v41, %v674_v41  ;;  %v222_v63 = vadd.f32 %v644_v17, %v221_v33  ;;  %v298_v30 = vmul.f32 %v654_v28, %v654_v28 }
  0xeb   :  { %v252_v43 = vsel %vm249_vm0, %v190_v35, 0.0  ;;  %v291_v44 = vmul.f32 %v190_v35, %v190_v35  ;;  %v467_v45 = vpack.c.bf16 %v190_v35, %v190_v35  ;;  %v211_v46 = vadd.f32 %v520_v40, %v644_v17  ;;  %412 = vst.msk [vmem:[%s789_s3 + $0xc] sm:$0xf] %vm408_vm1, %v469_v39 }
  0xec   :  { %v253_v48 = vadd.f32 %v252_v43, %v251_v38  ;;  %v202_v49 = vpop.f32.mrf.mxu0  ;;  %v234_v50 = vpop.f32.mrf.mxu1  ;;  %v311_v5 = vsel %vm249_vm0, %v293_v52, 0.0  ;;  %420 = vst.msk [vmem:[%s789_s3 + $0x2c] sm:$0xf] %vm408_vm1, %v477_v62  ;;  %v475_v14 = vpack.c.bf16 %v222_v63, %v222_v63  ;;  %v243_v23 = vadd.f32 %v528_v42, %v644_v17 }
  0xed   :  { %v307_v53 = vsel %vm249_vm0, %v291_v44, 0.0  ;;  %410 = vst.msk [vmem:[%s789_s3 + $0x4] sm:$0xf] %vm408_vm1, %v467_v45  ;;  %v472_v54 = vpack.c.bf16 %v211_v46, %v211_v46  ;;  %v203_v58 = vadd.f32 %v644_v17, %v202_v49  ;;  %v296_v12 = vmul.f32 %v211_v46, %v211_v46 }
  0xee   :  { %v255_v56 = vadd.f32 %v254_v47, %v253_v48  ;;  %v308_v57 = vadd.f32 %v307_v53, %v306_v51  ;;  %v521_v59 = vpop.f32.mrf.mxu0  ;;  %v529_v4 = vpop.f32.mrf.mxu1  ;;  %418 = vst.msk [vmem:[%s789_s3 + $0x24] sm:$0xf] %vm408_vm1, %v475_v14  ;;  %v235_v24 = vadd.f32 %v644_v17, %v234_v50  ;;  %v262_v25 = vsel %vm249_vm0, %v211_v46, 0.0 }
  0xef   :  { %415 = vst.msk [vmem:[%s789_s3 + $0x18] sm:$0xf] %vm408_vm1, %v472_v54  ;;  %v214_v61 = vadd.f32 %v521_v59, %v644_v17  ;;  %v294_v2 = vmul.f32 %v203_v58, %v203_v58  ;;  %v258_v6 = vsel %vm249_vm0, %v203_v58, 0.0  ;;  %v470_v7 = vpack.c.bf16 %v203_v58, %v203_v58 }
  0xf0   :  { %v310_v0 = vadd.f32 %v309_v55, %v308_v57  ;;  %v257_v1 = vadd.f32 %v256_v60, %v255_v56  ;;  %v205_v3 = vpop.f32.mrf.mxu0  ;;  %v237_v20 = vpop.f32.mrf.mxu1  ;;  %v246_v29 = vadd.f32 %v529_v4, %v644_v17  ;;  %v317_v34 = vsel %vm249_vm0, %v296_v12, 0.0 }
  0xf1   :  { %v473_v8 = vpack.c.bf16 %v214_v61, %v214_v61  ;;  %v206_v11 = vadd.f32 %v644_v17, %v205_v3  ;;  %v313_v13 = vsel %vm249_vm0, %v294_v2, 0.0  ;;  %413 = vst.msk [vmem:[%s789_s3 + $0x10] sm:$0xf] %vm408_vm1, %v470_v7  ;;  %v297_v26 = vmul.f32 %v214_v61, %v214_v61 }
  0xf2   :  { %v259_v9 = vadd.f32 %v258_v6, %v257_v1  ;;  %v312_v10 = vadd.f32 %v311_v5, %v310_v0  ;;  %v238_v33 = vadd.f32 %v644_v17, %v237_v20  ;;  %v264_v35 = vsel %vm249_vm0, %v214_v61, 0.0 }
  0xf3   :  { %416 = vst.msk [vmem:[%s789_s3 + $0x1c] sm:$0xf] %vm408_vm1, %v473_v8  ;;  %v260_v16 = vsel %vm249_vm0, %v206_v11, 0.0  ;;  %v295_v18 = vmul.f32 %v206_v11, %v206_v11  ;;  %v471_v19 = vpack.c.bf16 %v206_v11, %v206_v11  ;;  %v480_v36 = vpack.c.bf16 %v243_v23, %v243_v23 }
  0xf4   :  { %v314_v15 = vadd.f32 %v313_v13, %v312_v10  ;;  %v261_v22 = vadd.f32 %v260_v16, %v259_v9  ;;  %v478_v37 = vpack.c.bf16 %v235_v24, %v235_v24  ;;  %v319_v40 = vsel %vm249_vm0, %v297_v26, 0.0 }
  0xf5   :  { %v315_v27 = vsel %vm249_vm0, %v295_v18, 0.0  ;;  %414 = vst.msk [vmem:[%s789_s3 + $0x14] sm:$0xf] %vm408_vm1, %v471_v19  ;;  %v266_v42 = vsel %vm249_vm0, %v654_v28, 0.0  ;;  %v299_v43 = vmul.f32 %v222_v63, %v222_v63  ;;  %423 = vst.msk [vmem:[%s789_s3 + $0x38] sm:$0xf] %vm408_vm1, %v480_v36  ;;  %v481_v17 = vpack.c.bf16 %v246_v29, %v246_v29 }
  0xf6   :  { %v263_v31 = vadd.f32 %v262_v25, %v261_v22  ;;  %v316_v32 = vadd.f32 %v315_v27, %v314_v15  ;;  %421 = vst.msk [vmem:[%s789_s3 + $0x30] sm:$0xf] %vm408_vm1, %v478_v37  ;;  %v479_v46 = vpack.c.bf16 %v238_v33, %v238_v33  ;;  %v300_v47 = vmul.f32 %v648_v21, %v648_v21 }
  0xf7   :  { %v321_v28 = vsel %vm249_vm0, %v298_v30, 0.0  ;;  %v268_v48 = vsel %vm249_vm0, %v222_v63, 0.0  ;;  %424 = vst.msk [vmem:[%s789_s3 + $0x3c] sm:$0xf] %vm408_vm1, %v481_v17  ;;  %v270_v51 = vsel %vm249_vm0, %v648_v21, 0.0  ;;  %v301_v52 = vmul.f32 %v674_v41, %v674_v41 }
  0xf8   :  { %v318_v38 = vadd.f32 %v317_v34, %v316_v32  ;;  %v265_v39 = vadd.f32 %v264_v35, %v263_v31  ;;  %422 = vst.msk [vmem:[%s789_s3 + $0x34] sm:$0xf] %vm408_vm1, %v479_v46  ;;  %v323_v53 = vsel %vm249_vm0, %v299_v43, 0.0  ;;  %v325_v56 = vsel %vm249_vm0, %v300_v47, 0.0 }
  0xf9   :  { %v272_v57 = vsel %vm249_vm0, %v674_v41, 0.0  ;;  %v302_v58 = vmul.f32 %v235_v24, %v235_v24  ;;  %v327_v61 = vsel %vm249_vm0, %v301_v52, 0.0  ;;  %v274_v62 = vsel %vm249_vm0, %v235_v24, 0.0 }
  0xfa   :  { %v267_v44 = vadd.f32 %v266_v42, %v265_v39  ;;  %v320_v45 = vadd.f32 %v319_v40, %v318_v38  ;;  %v303_v21 = vmul.f32 %v238_v33, %v238_v33  ;;  %v304_v1 = vmul.f32 %v243_v23, %v243_v23 }
  0xfb   :  { %v329_v2 = vsel %vm249_vm0, %v302_v58, 0.0  ;;  %v276_v3 = vsel %vm249_vm0, %v238_v33, 0.0  ;;  %v278_v6 = vsel %vm249_vm0, %v243_v23, 0.0  ;;  %v305_v41 = vmul.f32 %v246_v29, %v246_v29 }
  0xfc   :  { %v269_v49 = vadd.f32 %v268_v48, %v267_v44  ;;  %v322_v50 = vadd.f32 %v321_v28, %v320_v45  ;;  %v331_v7 = vsel %vm249_vm0, %v303_v21, 0.0  ;;  %v333_v10 = vsel %vm249_vm0, %v304_v1, 0.0 }
  0xfd   :  { %v280_v11 = vsel %vm249_vm0, %v246_v29, 0.0  ;;  %v335_v14 = vsel %vm249_vm0, %v305_v41, 0.0 }
  0xfe   :  { %v271_v54 = vadd.f32 %v270_v51, %v269_v49  ;;  %v324_v55 = vadd.f32 %v323_v53, %v322_v50 }
 0x100   :  { %v326_v59 = vadd.f32 %v325_v56, %v324_v55  ;;  %v273_v60 = vadd.f32 %v272_v57, %v271_v54 }
 0x102   :  { %v275_v63 = vadd.f32 %v274_v62, %v273_v60  ;;  %v328_v0 = vadd.f32 %v327_v61, %v326_v59 }
 0x104   :  { %v330_v4 = vadd.f32 %v329_v2, %v328_v0  ;;  %v277_v5 = vadd.f32 %v276_v3, %v275_v63 }
 0x106   :  { %v279_v8 = vadd.f32 %v278_v6, %v277_v5  ;;  %v332_v9 = vadd.f32 %v331_v7, %v330_v4 }
 0x108   :  { %v281_v12 = vadd.f32 %v280_v11, %v279_v8  ;;  %v334_v13 = vadd.f32 %v333_v10, %v332_v9 }
 0x10a   :  { %v282_v15 = vrot.slane %v281_v12, 4  ;;  %v336_v16 = vadd.f32 %v335_v14, %v334_v13 }
 0x10c   :  { %v283_v18 = vadd.f32 %v282_v15, %v281_v12  ;;  %v337_v19 = vrot.slane %v336_v16, 4 }
 0x10e   :  { %v284_v20 = vrot.slane %v283_v18, 2  ;;  %v338_v22 = vadd.f32 %v337_v19, %v336_v16 }
 0x110   :  { %v285_v23 = vadd.f32 %v284_v20, %v283_v18  ;;  %v339_v24 = vrot.slane %v338_v22, 2 }
 0x112   :  { %v286_v25 = vrot.slane %v285_v23, 1  ;;  %v340_v26 = vadd.f32 %v339_v24, %v338_v22 }
 0x114   :  { %v287_v27 = vadd.f32 %v286_v25, %v285_v23  ;;  %v341_v30 = vrot.slane %v340_v26, 1 }
 0x116   :  { %289 = vst.msk [vmem:[%s787_s4] sm:$0x1] %vm288_vm2, %v287_v27  ;;  %v342_v29 = vadd.f32 %v341_v30, %v340_v26 }
 0x118   :  { %343 = vst.msk [vmem:[%s787_s4 + $0x1] sm:$0x1] %vm288_vm2, %v342_v29 }

// kernel: nlayer_discriminator_forward.7
= control target key start
LH: loop header
LB: loop body
LE: loop exit
PB: predicated region body
PF: predicated region fallthrough
CT: control target
= control target key end

     0   :  { %vm225_vm0 = vcmask 261120   ;;  %v385_v20 = vmov 0.0   ;;  %vm276_vm1 = vcmask 257024   ;;  %vm240_vm2 = vcmask 253952   ;;  %s508_s1 = inlined_call_operand.vmem [shape: bf16[256,128], index: 1, kind: input, shape index: {}]   ;;  %s509_s0 = inlined_call_operand.vmem [shape: bf16[32,256], index: 0, kind: input, shape index: {}]   ;;  %s510_s4 = inlined_call_operand.vmem [shape: f32[8,32], index: 4, kind: output, shape index: {1}]   ;;  %s511_s2 = inlined_call_operand.vmem [shape: f32[1,128], index: 2, kind: input, shape index: {}]   ;;  %s512_s3 = inlined_call_operand.vmem [shape: bf16[32,32], index: 3, kind: output, shape index: {0}]  }
   0x1   :  { %v363_v0 = vld [vmem:[%s508_s1 + $0x78] sm:$0xff]   ;;  %v365_v2 = vld [vmem:[%s508_s1 + $0x70] sm:$0xff]   ;;  %v367_v4 = vld [vmem:[%s508_s1 + $0x68] sm:$0xff]   ;;  %226 = vst.msk [vmem:[%s510_s4] sm:$0xff] %vm225_vm0, %v385_v20 }
   0x2   :  { %v364_v1 = vld [vmem:[%s508_s1 + $0x38] sm:$0xff]   ;;  %318 = vmatprep.subr.bf16.mxu0 %v363_v0  ;;  %346 = vmatprep.subr.bf16.mxu1 %v363_v0  ;;  %v366_v3 = vld [vmem:[%s508_s1 + $0x30] sm:$0xff]   ;;  %v368_v5 = vld [vmem:[%s508_s1 + $0x28] sm:$0xff]  }
   0x3   :  { %319 = vmatpush3.bf16.msra.mxu0 %v364_v1  ;;  %354 = vmatpush3.bf16.msra.mxu1 %v364_v1  ;;  %v369_v6 = vld [vmem:[%s508_s1 + $0x60] sm:$0xff]   ;;  %v371_v8 = vld [vmem:[%s508_s1 + $0x58] sm:$0xff]   ;;  %v373_v10 = vld [vmem:[%s508_s1 + $0x50] sm:$0xff]  }
   0x4   :  { %320 = vmatprep.subr.bf16.mxu0 %v365_v2  ;;  %347 = vmatprep.subr.bf16.mxu1 %v365_v2  ;;  %v370_v7 = vld [vmem:[%s508_s1 + $0x20] sm:$0xff]   ;;  %v372_v9 = vld [vmem:[%s508_s1 + $0x18] sm:$0xff]   ;;  %v374_v13 = vld [vmem:[%s508_s1 + $0x10] sm:$0xff]  }
   0x5   :  { %v381_v11 = vld [vmem:[%s509_s0 + $0x4] ss:$8 sps:$4 sm:$0xff]   ;;  %v384_v12 = vld [vmem:[%s509_s0 + $0x14] ss:$8 sps:$4 sm:$0xff]   ;;  %v379_v18 = vld [vmem:[%s509_s0] ss:$8 sps:$4 sm:$0xff]  }
   0x6   :  { %v375_v14 = vld [vmem:[%s508_s1 + $0x48] sm:$0xff]   ;;  %208 = vmatprep.mubr.bf16.mxu0 %v381_v11  ;;  %216 = vmatprep.mubr.bf16.mxu1 %v384_v12  ;;  %v377_v16 = vld [vmem:[%s508_s1 + $0x40] sm:$0xff]   ;;  %v382_v19 = vld [vmem:[%s509_s0 + $0x10] ss:$8 sps:$4 sm:$0xff]  }
   0x7   :  { %321 = vmatpush3.bf16.msra.mxu0 %v366_v3  ;;  %355 = vmatpush3.bf16.msra.mxu1 %v366_v3  ;;  %v376_v15 = vld [vmem:[%s508_s1 + $0x8] sm:$0xff]   ;;  %v378_v17 = vld [vmem:[%s508_s1] sm:$0xff]  }
   0x8   :  { %322 = vmatprep.subr.bf16.mxu0 %v367_v4  ;;  %348 = vmatprep.subr.bf16.mxu1 %v367_v4  ;;  %v289_v23 = vld [vmem:[%s511_s2] ss:$0 sm:$0xff] }
   0xb   :  { %323 = vmatpush3.bf16.msra.mxu0 %v368_v5  ;;  %356 = vmatpush3.bf16.msra.mxu1 %v368_v5 }
   0xc   :  { %324 = vmatprep.subr.bf16.mxu0 %v369_v6  ;;  %349 = vmatprep.subr.bf16.mxu1 %v369_v6 }
   0xf   :  { %325 = vmatpush3.bf16.msra.mxu0 %v370_v7  ;;  %357 = vmatpush3.bf16.msra.mxu1 %v370_v7 }
  0x10   :  { %326 = vmatprep.subr.bf16.mxu0 %v371_v8  ;;  %350 = vmatprep.subr.bf16.mxu1 %v371_v8 }
  0x13   :  { %327 = vmatpush3.bf16.msra.mxu0 %v372_v9  ;;  %358 = vmatpush3.bf16.msra.mxu1 %v372_v9 }
  0x14   :  { %328 = vmatprep.subr.bf16.mxu0 %v373_v10  ;;  %351 = vmatprep.subr.bf16.mxu1 %v373_v10 }
  0x17   :  { %329 = vmatpush3.bf16.msra.mxu0 %v374_v13  ;;  %359 = vmatpush3.bf16.msra.mxu1 %v374_v13 }
  0x18   :  { %330 = vmatprep.subr.bf16.mxu0 %v375_v14  ;;  %352 = vmatprep.subr.bf16.mxu1 %v375_v14 }
  0x1b   :  { %331 = vmatpush3.bf16.msra.mxu0 %v376_v15  ;;  %360 = vmatpush3.bf16.msra.mxu1 %v376_v15 }
  0x1c   :  { %332 = vmatprep.subr.bf16.mxu0 %v377_v16  ;;  %353 = vmatprep.subr.bf16.mxu1 %v377_v16 }
  0x1f   :  { %333 = vmatpush3.bf16.msra.mxu0 %v378_v17  ;;  %361 = vmatpush3.bf16.msra.mxu1 %v378_v17 }
  0x22   :  { %209 = vmatmul.mubr.bf16.vlgmr.msra.gmra.mxu0 %v379_v18  ;;  %217 = vmatmul.mubr.bf16.vlgmr.msra.gmra.mxu1 %v382_v19 }
  0xe2   :  { %v334_v21 = vpop.f32.mrf.mxu0  ;;  %v340_v22 = vpop.f32.mrf.mxu1 }
  0xe4   :  { %v335_v24 = vpop.f32.mrf.mxu0  ;;  %v341_v25 = vpop.f32.mrf.mxu1 }
  0xe5   :  { %v336_v26 = vadd.f32 %v335_v24, %v334_v21  ;;  %v342_v27 = vadd.f32 %v341_v25, %v340_v22 }
  0xe6   :  { %v337_v28 = vpop.f32.mrf.mxu0  ;;  %v343_v29 = vpop.f32.mrf.mxu1 }
  0xe7   :  { %v211_v30 = vadd.f32 %v336_v26, %v289_v23  ;;  %v219_v31 = vadd.f32 %v342_v27, %v289_v23 }
  0xe8   :  { %v338_v32 = vpop.f32.mrf.mxu0  ;;  %v344_v33 = vpop.f32.mrf.mxu1 }
  0xe9   :  { %v314_v34 = vpack.c.bf16 %v211_v30, %v211_v30  ;;  %v316_v35 = vpack.c.bf16 %v219_v31, %v219_v31  ;;  %v339_v36 = vadd.f32 %v338_v32, %v337_v28  ;;  %v345_v37 = vadd.f32 %v344_v33, %v343_v29 }
  0xea   :  { %v242_v38 = vmul.f32 %v211_v30, %v211_v30  ;;  %v227_v41 = vsel %vm225_vm0, %v211_v30, 0.0  ;;  %v244_v42 = vmul.f32 %v219_v31, %v219_v31  ;;  %v230_v49 = vsel %vm225_vm0, %v219_v31, 0.0 }
  0xeb   :  { %277 = vst.msk [vmem:[%s512_s3] sm:$0xf] %vm276_vm1, %v314_v34  ;;  %279 = vst.msk [vmem:[%s512_s3 + $0x8] sm:$0xf] %vm276_vm1, %v316_v35  ;;  %v214_v39 = vadd.f32 %v339_v36, %v289_v23  ;;  %v222_v40 = vadd.f32 %v345_v37, %v289_v23 }
  0xec   :  { %v246_v48 = vsel %vm225_vm0, %v242_v38, 0.0  ;;  %v249_v54 = vsel %vm225_vm0, %v244_v42, 0.0 }
  0xed   :  { %v228_v43 = vsel %vm225_vm0, %v214_v39, 0.0  ;;  %v243_v44 = vmul.f32 %v214_v39, %v214_v39  ;;  %v315_v45 = vpack.c.bf16 %v214_v39, %v214_v39  ;;  %v317_v47 = vpack.c.bf16 %v222_v40, %v222_v40 }
  0xee   :  { %v229_v46 = vadd.f32 %v228_v43, %v227_v41  ;;  %v245_v51 = vmul.f32 %v222_v40, %v222_v40  ;;  %v232_v55 = vsel %vm225_vm0, %v222_v40, 0.0 }
  0xef   :  { %v247_v50 = vsel %vm225_vm0, %v243_v44, 0.0  ;;  %278 = vst.msk [vmem:[%s512_s3 + $0x4] sm:$0xf] %vm276_vm1, %v315_v45  ;;  %280 = vst.msk [vmem:[%s512_s3 + $0xc] sm:$0xf] %vm276_vm1, %v317_v47 }
  0xf0   :  { %v248_v52 = vadd.f32 %v247_v50, %v246_v48  ;;  %v231_v53 = vadd.f32 %v230_v49, %v229_v46  ;;  %v251_v58 = vsel %vm225_vm0, %v245_v51, 0.0 }
  0xf2   :  { %v233_v56 = vadd.f32 %v232_v55, %v231_v53  ;;  %v250_v57 = vadd.f32 %v249_v54, %v248_v52 }
  0xf4   :  { %v234_v59 = vrot.slane %v233_v56, 4  ;;  %v252_v60 = vadd.f32 %v251_v58, %v250_v57 }
  0xf6   :  { %v235_v61 = vadd.f32 %v234_v59, %v233_v56  ;;  %v253_v62 = vrot.slane %v252_v60, 4 }
  0xf8   :  { %v236_v63 = vrot.slane %v235_v61, 2  ;;  %v254_v0 = vadd.f32 %v253_v62, %v252_v60 }
  0xfa   :  { %v237_v1 = vadd.f32 %v236_v63, %v235_v61  ;;  %v255_v2 = vrot.slane %v254_v0, 2 }
  0xfc   :  { %v238_v3 = vrot.slane %v237_v1, 1  ;;  %v256_v4 = vadd.f32 %v255_v2, %v254_v0 }
  0xfe   :  { %v239_v5 = vadd.f32 %v238_v3, %v237_v1  ;;  %v257_v6 = vrot.slane %v256_v4, 1 }
 0x100   :  { %241 = vst.msk [vmem:[%s510_s4] sm:$0x1] %vm240_vm2, %v239_v5  ;;  %v258_v7 = vadd.f32 %v257_v6, %v256_v4 }
 0x102   :  { %259 = vst.msk [vmem:[%s510_s4 + $0x1] sm:$0x1] %vm240_vm2, %v258_v7 }

// kernel: nlayer_discriminator_forward.8
= control target key start
LH: loop header
LB: loop body
LE: loop exit
PB: predicated region body
PF: predicated region fallthrough
CT: control target
= control target key end

     0   :  { %vm416_vm0 = vcmask 523264   ;;  %v618_v42 = vmov 0.0   ;;  %vm460_vm1 = vcmask 519168   ;;  %vm421_vm2 = vcmask 517120   ;;  %s789_s1 = inlined_call_operand.vmem [shape: bf16[512,128], index: 1, kind: input, shape index: {}]   ;;  %s790_s0 = inlined_call_operand.vmem [shape: bf16[18,512], index: 0, kind: input, shape index: {}]   ;;  %s791_s4 = inlined_call_operand.vmem [shape: f32[8,64], index: 4, kind: output, shape index: {1}]   ;;  %s792_s2 = inlined_call_operand.vmem [shape: f32[1,128], index: 2, kind: input, shape index: {}]   ;;  %s793_s3 = inlined_call_operand.vmem [shape: bf16[18,64], index: 3, kind: output, shape index: {0}]  }
   0x1   :  { %v576_v0 = vld [vmem:[%s789_s1 + $0x78] sm:$0xff]   ;;  %v580_v4 = vld [vmem:[%s789_s1 + $0x70] sm:$0xff]   ;;  %v584_v8 = vld [vmem:[%s789_s1 + $0x68] sm:$0xff]   ;;  %417 = vst.msk [vmem:[%s791_s4] sm:$0xff] %vm416_vm0, %v618_v42  ;;  %vm430_vm3 = vcmask 516096  }
   0x2   :  { %v577_v1 = vld [vmem:[%s789_s1 + $0xf8] sm:$0xff]   ;;  %519 = vmatprep.subr.bf16.mxu0 %v576_v0  ;;  %v581_v5 = vld [vmem:[%s789_s1 + $0xf0] sm:$0xff]   ;;  %v585_v9 = vld [vmem:[%s789_s1 + $0xe8] sm:$0xff]  }
   0x3   :  { %v578_v2 = vld [vmem:[%s789_s1 + $0x38] sm:$0xff]   ;;  %547 = vmatprep.subr.bf16.mxu1 %v577_v1  ;;  %v582_v6 = vld [vmem:[%s789_s1 + $0x30] sm:$0xff]   ;;  %v586_v10 = vld [vmem:[%s789_s1 + $0x28] sm:$0xff]  }
   0x4   :  { %v579_v3 = vld [vmem:[%s789_s1 + $0xb8] sm:$0xff]   ;;  %520 = vmatpush3.bf16.msra.mxu0 %v578_v2  ;;  %v583_v7 = vld [vmem:[%s789_s1 + $0xb0] sm:$0xff]   ;;  %v587_v11 = vld [vmem:[%s789_s1 + $0xa8] sm:$0xff]  }
   0x5   :  { %548 = vmatpush3.bf16.msra.mxu1 %v579_v3  ;;  %521 = vmatprep.subr.bf16.mxu0 %v580_v4  ;;  %v588_v12 = vld [vmem:[%s789_s1 + $0x60] sm:$0xff]   ;;  %v592_v16 = vld [vmem:[%s789_s1 + $0x58] sm:$0xff]   ;;  %v596_v20 = vld [vmem:[%s789_s1 + $0x50] sm:$0xff]  }
   0x6   :  { %549 = vmatprep.subr.bf16.mxu1 %v581_v5  ;;  %v589_v13 = vld [vmem:[%s789_s1 + $0xe0] sm:$0xff]   ;;  %v593_v17 = vld [vmem:[%s789_s1 + $0xd8] sm:$0xff]   ;;  %v597_v21 = vld [vmem:[%s789_s1 + $0xd0] sm:$0xff]  }
   0x7   :  { %v590_v14 = vld [vmem:[%s789_s1 + $0x20] sm:$0xff]   ;;  %v594_v18 = vld [vmem:[%s789_s1 + $0x18] sm:$0xff]   ;;  %v598_v22 = vld [vmem:[%s789_s1 + $0x10] sm:$0xff]  }
   0x8   :  { %522 = vmatpush3.bf16.msra.mxu0 %v582_v6  ;;  %v591_v15 = vld [vmem:[%s789_s1 + $0xa0] sm:$0xff]   ;;  %v595_v19 = vld [vmem:[%s789_s1 + $0x98] sm:$0xff]   ;;  %v599_v23 = vld [vmem:[%s789_s1 + $0x90] sm:$0xff]  }
   0x9   :  { %550 = vmatpush3.bf16.msra.mxu1 %v583_v7  ;;  %523 = vmatprep.subr.bf16.mxu0 %v584_v8  ;;  %v600_v24 = vld [vmem:[%s789_s1 + $0x48] sm:$0xff]   ;;  %v604_v28 = vld [vmem:[%s789_s1 + $0x40] sm:$0xff]  }
   0xa   :  { %551 = vmatprep.subr.bf16.mxu1 %v585_v9  ;;  %v601_v25 = vld [vmem:[%s789_s1 + $0xc8] sm:$0xff]   ;;  %v605_v29 = vld [vmem:[%s789_s1 + $0xc0] sm:$0xff]  }
   0xb   :  { %v602_v26 = vld [vmem:[%s789_s1 + $0x8] sm:$0xff]   ;;  %v606_v30 = vld [vmem:[%s789_s1] sm:$0xff]  }
   0xc   :  { %524 = vmatpush3.bf16.msra.mxu0 %v586_v10  ;;  %v603_v27 = vld [vmem:[%s789_s1 + $0x88] sm:$0xff]   ;;  %v607_v31 = vld [vmem:[%s789_s1 + $0x80] sm:$0xff]  }
   0xd   :  { %552 = vmatpush3.bf16.msra.mxu1 %v587_v11  ;;  %525 = vmatprep.subr.bf16.mxu0 %v588_v12  ;;  %v608_v32 = vld [vmem:[%s790_s0] ss:$16 sps:$4 sm:$0xff]   ;;  %v610_v33 = vld [vmem:[%s790_s0 + $0x4] ss:$16 sps:$4 sm:$0xff]   ;;  %v611_v34 = vld [vmem:[%s790_s0 + $0x8] ss:$16 sps:$4 sm:$0xff]  }
   0xe   :  { %553 = vmatprep.subr.bf16.mxu1 %v589_v13  ;;  %v613_v35 = vld [vmem:[%s790_s0 + $0xc] ss:$16 sps:$4 sm:$0xff]   ;;  %v21_v36 = vld [vmem:[%s790_s0 + $0x20] sm:$0x11]  ;;  %352 = vmatprep.mubr.bf16.mxu0 %v610_v33 }
   0xf   :  { %v478_v37 = vcombine.high %v21_v36, %v21_v36  ;;  %v22_v38 = vld [vmem:[%s790_s0 + $0x28] sm:$0x11]  ;;  %400 = vmatprep.mubr.bf16.mxu1 %v613_v35  ;;  %v477_v40 = vcombine.low %v21_v36, %v21_v36  ;;  %v472_v45 = vld [vmem:[%s792_s2] ss:$0 sm:$0xff] }
  0x10   :  { %526 = vmatpush3.bf16.msra.mxu0 %v590_v14  ;;  %v480_v39 = vcombine.high %v22_v38, %v22_v38  ;;  %v479_v41 = vcombine.low %v22_v38, %v22_v38 }
  0x11   :  { %554 = vmatpush3.bf16.msra.mxu1 %v591_v15  ;;  %527 = vmatprep.subr.bf16.mxu0 %v592_v16 }
  0x12   :  { %555 = vmatprep.subr.bf16.mxu1 %v593_v17 }
  0x14   :  { %528 = vmatpush3.bf16.msra.mxu0 %v594_v18 }
  0x15   :  { %556 = vmatpush3.bf16.msra.mxu1 %v595_v19  ;;  %529 = vmatprep.subr.bf16.mxu0 %v596_v20 }
  0x16   :  { %557 = vmatprep.subr.bf16.mxu1 %v597_v21 }
  0x18   :  { %530 = vmatpush3.bf16.msra.mxu0 %v598_v22 }
  0x19   :  { %558 = vmatpush3.bf16.msra.mxu1 %v599_v23  ;;  %531 = vmatprep.subr.bf16.mxu0 %v600_v24 }
  0x1a   :  { %559 = vmatprep.subr.bf16.mxu1 %v601_v25 }
  0x1c   :  { %532 = vmatpush3.bf16.msra.mxu0 %v602_v26 }
  0x1d   :  { %560 = vmatpush3.bf16.msra.mxu1 %v603_v27  ;;  %533 = vmatprep.subr.bf16.mxu0 %v604_v28 }
  0x1e   :  { %561 = vmatprep.subr.bf16.mxu1 %v605_v29 }
  0x20   :  { %534 = vmatpush3.bf16.msra.mxu0 %v606_v30 }
  0x21   :  { %562 = vmatpush3.bf16.msra.mxu1 %v607_v31 }
  0x23   :  { %353 = vmatmul.mubr.bf16.vlgmr.msra.gmra.mxu0 %v608_v32 }
  0x24   :  { %401 = vmatmul.mubr.bf16.vlgmr.msra.gmra.mxu1 %v611_v34  ;;  %360 = vmatprep.mubr.bf16.mxu0 %v478_v37 }
  0x25   :  { %408 = vmatprep.mubr.bf16.mxu1 %v480_v39 }
  0x2b   :  { %361 = vmatmul.mubr.bf16.gmra.mxu0 %v477_v40 }
  0x2c   :  { %409 = vmatmul.mubr.bf16.gmra.mxu1 %v479_v41 }
  0xe3   :  { %v535_v43 = vpop.f32.mrf.mxu0 }
  0xe4   :  { %v563_v44 = vpop.f32.mrf.mxu1 }
  0xe5   :  { %v536_v46 = vpop.f32.mrf.mxu0 }
  0xe6   :  { %v537_v47 = vadd.f32 %v536_v46, %v535_v43  ;;  %v564_v48 = vpop.f32.mrf.mxu1 }
  0xe7   :  { %v538_v49 = vpop.f32.mrf.mxu0  ;;  %v565_v51 = vadd.f32 %v564_v48, %v563_v44 }
  0xe8   :  { %v355_v50 = vadd.f32 %v537_v47, %v472_v45  ;;  %v566_v52 = vpop.f32.mrf.mxu1 }
  0xe9   :  { %v539_v53 = vpop.f32.mrf.mxu0 }
  0xea   :  { %v403_v54 = vadd.f32 %v565_v51, %v355_v50  ;;  %v540_v55 = vadd.f32 %v539_v53, %v538_v49  ;;  %v567_v56 = vpop.f32.mrf.mxu1 }
  0xeb   :  { %v541_v57 = vpop.f32.mrf.mxu0  ;;  %v568_v60 = vadd.f32 %v567_v56, %v566_v52 }
  0xec   :  { %v516_v58 = vpack.c.bf16 %v403_v54, %v403_v54  ;;  %v358_v59 = vadd.f32 %v540_v55, %v472_v45  ;;  %v569_v61 = vpop.f32.mrf.mxu1  ;;  %v432_v2 = vmul.f32 %v403_v54, %v403_v54  ;;  %v418_v11 = vsel %vm416_vm0, %v403_v54, 0.0 }
  0xed   :  { %v542_v62 = vpop.f32.mrf.mxu0 }
  0xee   :  { %461 = vst.msk [vmem:[%s793_s3] sm:$0xf] %vm460_vm1, %v516_v58  ;;  %v406_v63 = vadd.f32 %v568_v60, %v358_v59  ;;  %v543_v0 = vadd.f32 %v542_v62, %v541_v57  ;;  %v570_v1 = vpop.f32.mrf.mxu1  ;;  %v435_v16 = vsel %vm416_vm0, %v432_v2, 0.0 }
  0xef   :  { %v571_v3 = vadd.f32 %v570_v1, %v569_v61  ;;  %v544_v4 = vpop.f32.mrf.mxu0 }
  0xf0   :  { %v419_v5 = vsel %vm416_vm0, %v406_v63, 0.0  ;;  %v433_v6 = vmul.f32 %v406_v63, %v406_v63  ;;  %v517_v7 = vpack.c.bf16 %v406_v63, %v406_v63  ;;  %v363_v8 = vadd.f32 %v543_v0, %v472_v45  ;;  %v572_v9 = vpop.f32.mrf.mxu1 }
  0xf1   :  { %v545_v10 = vpop.f32.mrf.mxu0  ;;  %v420_v15 = vadd.f32 %v419_v5, %v418_v11 }
  0xf2   :  { %v436_v12 = vsel %vm416_vm0, %v433_v6, 0.0  ;;  %462 = vst.msk [vmem:[%s793_s3 + $0x4] sm:$0xf] %vm460_vm1, %v517_v7  ;;  %v411_v13 = vadd.f32 %v571_v3, %v363_v8  ;;  %v573_v14 = vpop.f32.mrf.mxu1 }
  0xf3   :  { %v437_v20 = vadd.f32 %v436_v12, %v435_v16 }
  0xf4   :  { %v422_v17 = vsel %vm421_vm2, %v411_v13, 0.0  ;;  %v434_v18 = vmul.f32 %v411_v13, %v411_v13  ;;  %v518_v19 = vpack.c.bf16 %v411_v13, %v411_v13 }
  0xf5   :  { %v423_v21 = vadd.f32 %v422_v17, %v420_v15 }
  0xf6   :  { %v438_v22 = vsel %vm421_vm2, %v434_v18, 0.0  ;;  %463 = vst.msk [vmem:[%s793_s3 + $0x8] sm:$0x1] %vm430_vm3, %v518_v19 }
  0xf7   :  { %v424_v23 = vrot.slane %v423_v21, 4  ;;  %v439_v24 = vadd.f32 %v438_v22, %v437_v20 }
  0xf9   :  { %v425_v25 = vadd.f32 %v424_v23, %v423_v21  ;;  %v440_v26 = vrot.slane %v439_v24, 4 }
  0xfb   :  { %v426_v27 = vrot.slane %v425_v25, 2  ;;  %v441_v28 = vadd.f32 %v440_v26, %v439_v24 }
  0xfd   :  { %v427_v29 = vadd.f32 %v426_v27, %v425_v25  ;;  %v442_v30 = vrot.slane %v441_v28, 2 }
  0xff   :  { %v428_v31 = vrot.slane %v427_v29, 1  ;;  %v443_v32 = vadd.f32 %v442_v30, %v441_v28 }
 0x101   :  { %v429_v33 = vadd.f32 %v428_v31, %v427_v29  ;;  %v444_v34 = vrot.slane %v443_v32, 1 }
 0x103   :  { %431 = vst.msk [vmem:[%s791_s4] sm:$0x1] %vm430_vm3, %v429_v33  ;;  %v445_v35 = vadd.f32 %v444_v34, %v443_v32 }
 0x105   :  { %446 = vst.msk [vmem:[%s791_s4 + $0x1] sm:$0x1] %vm430_vm3, %v445_v35 }

// kernel: nlayer_discriminator_forward.9
= control target key start
LH: loop header
LB: loop body
LE: loop exit
PB: predicated region body
PF: predicated region fallthrough
CT: control target
= control target key end

     0   :  { %vm726_vm0 = vcmask 7168   ;;  %s1195_s1 = inlined_call_operand.vmem [shape: bf16[1024,128], index: 1, kind: input, shape index: {}]   ;;  %s1196_s0 = inlined_call_operand.vmem [shape: bf16[8,1024], index: 0, kind: input, shape index: {}]   ;;  %s1197_s2 = inlined_call_operand.vmem [shape: f32[1,128], index: 2, kind: input, shape index: {}]   ;;  %s1198_s3 = inlined_call_operand.vmem [shape: f32[8,1], index: 3, kind: output, shape index: {}]  }
   0x1   :  { %v893_v0 = vld [vmem:[%s1195_s1 + $0x78] sm:$0xff]   ;;  %v897_v4 = vld [vmem:[%s1195_s1 + $0x70] sm:$0xff]   ;;  %v901_v8 = vld [vmem:[%s1195_s1 + $0x68] sm:$0xff]  }
   0x2   :  { %v894_v1 = vld [vmem:[%s1195_s1 + $0xf8] sm:$0xff]   ;;  %805 = vmatprep.subr.bf16.mxu0 %v893_v0  ;;  %v898_v5 = vld [vmem:[%s1195_s1 + $0xf0] sm:$0xff]   ;;  %v902_v9 = vld [vmem:[%s1195_s1 + $0xe8] sm:$0xff]  }
   0x3   :  { %v895_v2 = vld [vmem:[%s1195_s1 + $0x38] sm:$0xff]   ;;  %827 = vmatprep.subr.bf16.mxu1 %v894_v1  ;;  %v899_v6 = vld [vmem:[%s1195_s1 + $0x30] sm:$0xff]   ;;  %v903_v10 = vld [vmem:[%s1195_s1 + $0x28] sm:$0xff]  }
   0x4   :  { %v896_v3 = vld [vmem:[%s1195_s1 + $0xb8] sm:$0xff]   ;;  %806 = vmatpush3.bf16.msra.mxu0 %v895_v2  ;;  %v900_v7 = vld [vmem:[%s1195_s1 + $0xb0] sm:$0xff]   ;;  %v904_v11 = vld [vmem:[%s1195_s1 + $0xa8] sm:$0xff]  }
   0x5   :  { %828 = vmatpush3.bf16.msra.mxu1 %v896_v3  ;;  %807 = vmatprep.subr.bf16.mxu0 %v897_v4  ;;  %v905_v12 = vld [vmem:[%s1195_s1 + $0x60] sm:$0xff]   ;;  %v909_v16 = vld [vmem:[%s1195_s1 + $0x58] sm:$0xff]   ;;  %v913_v20 = vld [vmem:[%s1195_s1 + $0x50] sm:$0xff]  }
   0x6   :  { %829 = vmatprep.subr.bf16.mxu1 %v898_v5  ;;  %v906_v13 = vld [vmem:[%s1195_s1 + $0xe0] sm:$0xff]   ;;  %v910_v17 = vld [vmem:[%s1195_s1 + $0xd8] sm:$0xff]   ;;  %v914_v21 = vld [vmem:[%s1195_s1 + $0xd0] sm:$0xff]  }
   0x7   :  { %v907_v14 = vld [vmem:[%s1195_s1 + $0x20] sm:$0xff]   ;;  %v911_v18 = vld [vmem:[%s1195_s1 + $0x18] sm:$0xff]   ;;  %v915_v22 = vld [vmem:[%s1195_s1 + $0x10] sm:$0xff]  }
   0x8   :  { %808 = vmatpush3.bf16.msra.mxu0 %v899_v6  ;;  %v908_v15 = vld [vmem:[%s1195_s1 + $0xa0] sm:$0xff]   ;;  %v912_v19 = vld [vmem:[%s1195_s1 + $0x98] sm:$0xff]   ;;  %v916_v23 = vld [vmem:[%s1195_s1 + $0x90] sm:$0xff]  }
   0x9   :  { %830 = vmatpush3.bf16.msra.mxu1 %v900_v7  ;;  %809 = vmatprep.subr.bf16.mxu0 %v901_v8  ;;  %v917_v24 = vld [vmem:[%s1195_s1 + $0x48] sm:$0xff]   ;;  %v921_v28 = vld [vmem:[%s1195_s1 + $0x40] sm:$0xff]   ;;  %v929_v38 = vld [vmem:[%s1195_s1 + $0x178] sm:$0xff]  }
   0xa   :  { %831 = vmatprep.subr.bf16.mxu1 %v902_v9  ;;  %v918_v25 = vld [vmem:[%s1195_s1 + $0xc8] sm:$0xff]   ;;  %v922_v29 = vld [vmem:[%s1195_s1 + $0xc0] sm:$0xff]   ;;  %v930_v39 = vld [vmem:[%s1195_s1 + $0x1f8] sm:$0xff]  }
   0xb   :  { %v919_v26 = vld [vmem:[%s1195_s1 + $0x8] sm:$0xff]   ;;  %v923_v30 = vld [vmem:[%s1195_s1] sm:$0xff]   ;;  %v931_v40 = vld [vmem:[%s1195_s1 + $0x138] sm:$0xff]  }
   0xc   :  { %810 = vmatpush3.bf16.msra.mxu0 %v903_v10  ;;  %v920_v27 = vld [vmem:[%s1195_s1 + $0x88] sm:$0xff]   ;;  %v924_v31 = vld [vmem:[%s1195_s1 + $0x80] sm:$0xff]   ;;  %v932_v41 = vld [vmem:[%s1195_s1 + $0x1b8] sm:$0xff]  }
   0xd   :  { %832 = vmatpush3.bf16.msra.mxu1 %v904_v11  ;;  %811 = vmatprep.subr.bf16.mxu0 %v905_v12  ;;  %v15_v32 = vld [vmem:[%s1196_s0] sm:$0xff]  ;;  %v16_v33 = vld [vmem:[%s1196_s0 + $0x8] sm:$0xff]  ;;  %v933_v42 = vld [vmem:[%s1195_s1 + $0x170] sm:$0xff]  }
   0xe   :  { %833 = vmatprep.subr.bf16.mxu1 %v906_v13  ;;  %v733_v34 = vcombine.low %v15_v32, %v15_v32  ;;  %v734_v35 = vcombine.high %v15_v32, %v15_v32  ;;  %v735_v36 = vcombine.low %v16_v33, %v16_v33  ;;  %v736_v37 = vcombine.high %v16_v33, %v16_v33  ;;  %v934_v43 = vld [vmem:[%s1195_s1 + $0x1f0] sm:$0xff]   ;;  %v937_v46 = vld [vmem:[%s1195_s1 + $0x168] sm:$0xff]   ;;  %v941_v50 = vld [vmem:[%s1195_s1 + $0x160] sm:$0xff]  }
   0xf   :  { %v935_v44 = vld [vmem:[%s1195_s1 + $0x130] sm:$0xff]   ;;  %v938_v47 = vld [vmem:[%s1195_s1 + $0x1e8] sm:$0xff]   ;;  %v942_v51 = vld [vmem:[%s1195_s1 + $0x1e0] sm:$0xff]  }
  0x10   :  { %812 = vmatpush3.bf16.msra.mxu0 %v907_v14  ;;  %598 = vmatprep.mubr.bf16.mxu0 %v734_v35  ;;  %v936_v45 = vld [vmem:[%s1195_s1 + $0x1b0] sm:$0xff]   ;;  %v939_v48 = vld [vmem:[%s1195_s1 + $0x128] sm:$0xff]   ;;  %v943_v52 = vld [vmem:[%s1195_s1 + $0x120] sm:$0xff]  }
  0x11   :  { %834 = vmatpush3.bf16.msra.mxu1 %v908_v15  ;;  %813 = vmatprep.subr.bf16.mxu0 %v909_v16  ;;  %v940_v49 = vld [vmem:[%s1195_s1 + $0x1a8] sm:$0xff]   ;;  %v944_v53 = vld [vmem:[%s1195_s1 + $0x1a0] sm:$0xff]   ;;  %v945_v54 = vld [vmem:[%s1195_s1 + $0x158] sm:$0xff]  }
  0x12   :  { %835 = vmatprep.subr.bf16.mxu1 %v910_v17  ;;  %638 = vmatprep.mubr.bf16.mxu1 %v736_v37  ;;  %v946_v55 = vld [vmem:[%s1195_s1 + $0x1d8] sm:$0xff]   ;;  %v949_v58 = vld [vmem:[%s1195_s1 + $0x150] sm:$0xff]   ;;  %v953_v62 = vld [vmem:[%s1195_s1 + $0x148] sm:$0xff]  }
  0x13   :  { %v947_v56 = vld [vmem:[%s1195_s1 + $0x118] sm:$0xff]   ;;  %v950_v59 = vld [vmem:[%s1195_s1 + $0x1d0] sm:$0xff]   ;;  %v954_v63 = vld [vmem:[%s1195_s1 + $0x1c8] sm:$0xff]  }
  0x14   :  { %814 = vmatpush3.bf16.msra.mxu0 %v911_v18  ;;  %v948_v57 = vld [vmem:[%s1195_s1 + $0x198] sm:$0xff]   ;;  %v951_v60 = vld [vmem:[%s1195_s1 + $0x110] sm:$0xff]   ;;  %v955_v0 = vld [vmem:[%s1195_s1 + $0x108] sm:$0xff]  }
  0x15   :  { %836 = vmatpush3.bf16.msra.mxu1 %v912_v19  ;;  %815 = vmatprep.subr.bf16.mxu0 %v913_v20  ;;  %v952_v61 = vld [vmem:[%s1195_s1 + $0x190] sm:$0xff]   ;;  %v956_v1 = vld [vmem:[%s1195_s1 + $0x188] sm:$0xff]   ;;  %v957_v2 = vld [vmem:[%s1195_s1 + $0x140] sm:$0xff]  }
  0x16   :  { %837 = vmatprep.subr.bf16.mxu1 %v914_v21  ;;  %v958_v3 = vld [vmem:[%s1195_s1 + $0x1c0] sm:$0xff]   ;;  %v17_v6 = vld [vmem:[%s1196_s0 + $0x10] sm:$0xff]  ;;  %v18_v9 = vld [vmem:[%s1196_s0 + $0x18] sm:$0xff] }
  0x17   :  { %v959_v4 = vld [vmem:[%s1195_s1 + $0x100] sm:$0xff]   ;;  %v737_v7 = vcombine.low %v17_v6, %v17_v6  ;;  %v738_v8 = vcombine.high %v17_v6, %v17_v6  ;;  %v739_v10 = vcombine.low %v18_v9, %v18_v9  ;;  %v740_v11 = vcombine.high %v18_v9, %v18_v9 }
  0x18   :  { %816 = vmatpush3.bf16.msra.mxu0 %v915_v22  ;;  %v960_v5 = vld [vmem:[%s1195_s1 + $0x180] sm:$0xff]  }
  0x19   :  { %838 = vmatpush3.bf16.msra.mxu1 %v916_v23  ;;  %817 = vmatprep.subr.bf16.mxu0 %v917_v24  ;;  %v732_v21 = vld [vmem:[%s1197_s2] ss:$0 sm:$0xff] }
  0x1a   :  { %839 = vmatprep.subr.bf16.mxu1 %v918_v25 }
  0x1c   :  { %818 = vmatpush3.bf16.msra.mxu0 %v919_v26 }
  0x1d   :  { %840 = vmatpush3.bf16.msra.mxu1 %v920_v27  ;;  %819 = vmatprep.subr.bf16.mxu0 %v921_v28 }
  0x1e   :  { %841 = vmatprep.subr.bf16.mxu1 %v922_v29 }
  0x20   :  { %820 = vmatpush3.bf16.msra.mxu0 %v923_v30 }
  0x21   :  { %842 = vmatpush3.bf16.msra.mxu1 %v924_v31  ;;  %849 = vmatprep.subr.bf16.mxu0 %v929_v38 }
  0x22   :  { %871 = vmatprep.subr.bf16.mxu1 %v930_v39 }
  0x23   :  { %599 = vmatmul.mubr.bf16.vlgmr.msra.gmra.mxu0 %v733_v34 }
  0x24   :  { %639 = vmatmul.mubr.bf16.vlgmr.msra.gmra.mxu1 %v735_v36  ;;  %850 = vmatpush3.bf16.msra.mxu0 %v931_v40 }
  0x25   :  { %872 = vmatpush3.bf16.msra.mxu1 %v932_v41  ;;  %851 = vmatprep.subr.bf16.mxu0 %v933_v42 }
  0x26   :  { %873 = vmatprep.subr.bf16.mxu1 %v934_v43  ;;  %678 = vmatprep.mubr.bf16.mxu0 %v738_v8 }
  0x27   :  { %718 = vmatprep.mubr.bf16.mxu1 %v740_v11 }
  0x28   :  { %852 = vmatpush3.bf16.msra.mxu0 %v935_v44 }
  0x29   :  { %874 = vmatpush3.bf16.msra.mxu1 %v936_v45  ;;  %853 = vmatprep.subr.bf16.mxu0 %v937_v46 }
  0x2a   :  { %875 = vmatprep.subr.bf16.mxu1 %v938_v47 }
  0x2c   :  { %854 = vmatpush3.bf16.msra.mxu0 %v939_v48 }
  0x2d   :  { %876 = vmatpush3.bf16.msra.mxu1 %v940_v49  ;;  %855 = vmatprep.subr.bf16.mxu0 %v941_v50 }
  0x2e   :  { %877 = vmatprep.subr.bf16.mxu1 %v942_v51 }
  0x30   :  { %856 = vmatpush3.bf16.msra.mxu0 %v943_v52 }
  0x31   :  { %878 = vmatpush3.bf16.msra.mxu1 %v944_v53  ;;  %857 = vmatprep.subr.bf16.mxu0 %v945_v54 }
  0x32   :  { %879 = vmatprep.subr.bf16.mxu1 %v946_v55 }
  0x34   :  { %858 = vmatpush3.bf16.msra.mxu0 %v947_v56 }
  0x35   :  { %880 = vmatpush3.bf16.msra.mxu1 %v948_v57  ;;  %859 = vmatprep.subr.bf16.mxu0 %v949_v58 }
  0x36   :  { %881 = vmatprep.subr.bf16.mxu1 %v950_v59 }
  0x38   :  { %860 = vmatpush3.bf16.msra.mxu0 %v951_v60 }
  0x39   :  { %882 = vmatpush3.bf16.msra.mxu1 %v952_v61  ;;  %861 = vmatprep.subr.bf16.mxu0 %v953_v62 }
  0x3a   :  { %883 = vmatprep.subr.bf16.mxu1 %v954_v63 }
  0x3c   :  { %862 = vmatpush3.bf16.msra.mxu0 %v955_v0 }
  0x3d   :  { %884 = vmatpush3.bf16.msra.mxu1 %v956_v1  ;;  %863 = vmatprep.subr.bf16.mxu0 %v957_v2 }
  0x3e   :  { %885 = vmatprep.subr.bf16.mxu1 %v958_v3 }
  0x40   :  { %864 = vmatpush3.bf16.msra.mxu0 %v959_v4 }
  0x41   :  { %886 = vmatpush3.bf16.msra.mxu1 %v960_v5 }
  0x43   :  { %679 = vmatmul.mubr.bf16.vlgmr.msra.gmra.mxu0 %v737_v7 }
  0x44   :  { %719 = vmatmul.mubr.bf16.vlgmr.msra.gmra.mxu1 %v739_v10 }
  0xe3   :  { %v821_v12 = vpop.f32.mrf.mxu0 }
  0xe4   :  { %v843_v13 = vpop.f32.mrf.mxu1 }
  0xe5   :  { %v822_v14 = vpop.f32.mrf.mxu0 }
  0xe6   :  { %v844_v15 = vpop.f32.mrf.mxu1  ;;  %v823_v20 = vadd.f32 %v822_v14, %v821_v12 }
  0xe7   :  { %v824_v16 = vpop.f32.mrf.mxu0  ;;  %v845_v23 = vadd.f32 %v844_v15, %v843_v13 }
  0xe8   :  { %v846_v17 = vpop.f32.mrf.mxu1  ;;  %v601_v22 = vadd.f32 %v823_v20, %v732_v21 }
  0xe9   :  { %v825_v18 = vpop.f32.mrf.mxu0 }
  0xea   :  { %v847_v19 = vpop.f32.mrf.mxu1  ;;  %v641_v28 = vadd.f32 %v845_v23, %v601_v22 }
 0x103   :  { %v865_v24 = vpop.f32.mrf.mxu0 }
 0x104   :  { %v887_v25 = vpop.f32.mrf.mxu1 }
 0x105   :  { %v866_v26 = vpop.f32.mrf.mxu0 }
 0x106   :  { %v888_v27 = vpop.f32.mrf.mxu1  ;;  %v867_v29 = vadd.f32 %v866_v26, %v865_v24 }
 0x107   :  { %v868_v30 = vpop.f32.mrf.mxu0  ;;  %v889_v33 = vadd.f32 %v888_v27, %v887_v25 }
 0x108   :  { %v890_v31 = vpop.f32.mrf.mxu1  ;;  %v681_v32 = vadd.f32 %v867_v29, %v641_v28 }
 0x109   :  { %v869_v34 = vpop.f32.mrf.mxu0 }
 0x10a   :  { %v891_v35 = vpop.f32.mrf.mxu1  ;;  %v721_v36 = vadd.f32 %v889_v33, %v681_v32 }
 0x10c   :  { %727 = vst.msk [vmem:[%s1198_s3] sm:$0xff] %vm726_vm0, %v721_v36 }

</bundles_post_ra>
